<compile_context>
chip_gen: v7x
topology: tpu7x:2x2x1
jax: 0.10.0
libtpu: 0.0.40
codegen_flags: <defaults>
</compile_context>

<pallas_src>
import functools

import jax
import jax.numpy as jnp
import numpy as np
from jax import lax
from jax.experimental import pallas as pl
from jax.experimental.pallas import tpu as pltpu

_OUT_LANES = 128   # lane-dense partial-sum row (first 2*num_k lanes are used)
_OUT_SUBLANES = 8  # keep the output block (8, 128)-aligned


def _fused_profile_kernel(x_ref, y_ref, out_ref, *, exps, chunk, valid_len, unroll):
    """One row tile: partial sum(|entropy_x - entropy_y|) and sum((content_x - content_y)^2)
    for every kernel size k = 2**e, e in `exps` (sorted ascending)."""
    tr, l_pad = x_ref.shape
    num_chunks = tr // chunk
    max_e = max(exps)
    tiny = jnp.float32(1e-30)

    # Hoisted constants: broadcast_in_dim is not CSE'd by JAX, so build iotas / masks
    # once outside the chunk loop.  They constant-fold into the kernel.
    lane = lax.broadcasted_iota(jnp.int32, (chunk, l_pad), 1)
    out_sub = lax.broadcasted_iota(jnp.int32, (_OUT_SUBLANES, _OUT_LANES), 0)
    out_lane = lax.broadcasted_iota(jnp.int32, (_OUT_SUBLANES, _OUT_LANES), 1)
    # Valid window starts for kernel size 2**e: lanes [0, valid_len - k].  Lanes beyond
    # that hold sums over lane padding and/or roll wrap-around and are masked out here.
    valid = {e: lane < (valid_len - (1 << e) + 1) for e in exps}

    def chunk_body(ci, acc):
        r0 = pl.multiple_of(ci * chunk, chunk)
        x = x_ref[pl.ds(r0, chunk), :].astype(jnp.float32)   # (chunk, l_pad)
        y = y_ref[pl.ds(r0, chunk), :].astype(jnp.float32)

        # One exp per element: row-max stabilisation shared by every window of the row.
        # NOTE(domain): this differs from the reference's per-window stabilisation only
        # through exp underflow; rows with dynamic range >~80 would degrade (clamped by
        # `tiny`, never NaN).  Realistic / normalised signals are far from that regime.
        cx = jnp.max(x, axis=-1, keepdims=True)               # (chunk, 1)
        cy = jnp.max(y, axis=-1, keepdims=True)
        c_diff = cx - cy
        ex = jnp.exp(x - cx)
        ey = jnp.exp(y - cy)

        # Running sliding-window sums (window size 1).  Doubling the window costs one
        # roll + add per array, so all kernel sizes share a single O(log2 k_max) tree.
        # Everything stays (chunk, l_pad)-shaped -> lane dense, register resident.
        s_ex, s_tx = ex, ex * x        # softmax denominator / weighted numerator (x)
        s_ey, s_ty = ey, ey * y        # ... (y)
        s_d = x - y                    # content path only needs the difference

        acc_c = jnp.zeros((_OUT_SUBLANES, _OUT_LANES), jnp.float32)
        for e in range(max_e + 1):
            if e > 0:
                w = 1 << (e - 1)
                amt = l_pad - w        # == roll by -w; positive static shift

                def dbl(a, amt=amt):
                    # window-sum doubling: S_{2w}[i] = S_w[i] + S_w[(i + w) mod l_pad]
                    # (pltpu.roll lands on the XLU slot; wrapped lanes are masked later)
                    return a + pltpu.roll(a, amt, 1)

                s_ex, s_tx = dbl(s_ex), dbl(s_tx)
                s_ey, s_ty = dbl(s_ey), dbl(s_ty)
                s_d = dbl(s_d)

            if e in exps:
                k = 1 << e
                idx = exps.index(e)
                m = valid[e]
                sx = jnp.maximum(s_ex, tiny)   # guard exp-underflow / padded lanes
                sy = jnp.maximum(s_ey, tiny)
                # Exact reciprocals (XLA lowers f32 divide to EUP rcp + Newton); the
                # approx=True variant was not adopted to keep the 1e-4/1e-5 tolerance.
                rx = 1.0 / sx
                ry = 1.0 / sy
                # sum_j p_j log p_j = T/S - c - log S ; difference of the x / y forms
                # with the two logs folded into one:  log sx - log sy = log(sx * (1/sy)).
                d_ent = s_tx * rx - s_ty * ry - c_diff - jnp.log(sx * ry)
                ent_p = jnp.sum(jnp.where(m, jnp.abs(d_ent), 0.0)) / float(k)
                con_p = jnp.sum(jnp.where(m, s_d * s_d, 0.0)) / float(k * k)
                acc_c = acc_c + jnp.where((out_sub == 0) & (out_lane == 2 * idx), ent_p, 0.0)
                acc_c = acc_c + jnp.where((out_sub == 0) & (out_lane == 2 * idx + 1), con_p, 0.0)
        return acc + acc_c

    acc0 = jnp.zeros((_OUT_SUBLANES, _OUT_LANES), jnp.float32)
    acc = lax.fori_loop(0, num_chunks, chunk_body, acc0, unroll=unroll)
    out_ref[...] = acc[None]


def _round_up(v, m):
    return (v + m - 1) // m * m


def _choose_row_tile(r, l_pad, itemsize, chunk):
    # The only large VMEM consumers are the double-buffered x / y input blocks (the
    # running sums now live in vregs).  A ~24 MiB input budget sits comfortably inside
    # the 32 MiB default scoped VMEM on v6e/v7x (v7x physical VMEM is only 64 MiB) and
    # we raise the limit explicitly for v5e's 16 MiB default.
    budget_bytes = 24 * 1024 * 1024
    bytes_per_row = 2 * 2 * l_pad * itemsize          # 2 inputs x 2 pipeline buffers
    tr = max(chunk, (budget_bytes // bytes_per_row) // chunk * chunk)
    r_min = _round_up(r, chunk)
    # Keep at least two grid steps whenever there are >= 2 row chunks so the "parallel"
    # grid axis can give both v7x TensorCores work.
    if r_min >= 2 * chunk:
        tr = min(tr, _round_up((r_min + 1) // 2, chunk))
    tr = min(tr, r_min)
    r_pad = _round_up(r, tr)
    return tr, r_pad


def _profile_partials(x2, y2, exps):
    """Runs the fused kernel over row tiles; returns summed partials, shape (_OUT_LANES,)."""
    r, l = x2.shape
    num_k = len(exps)
    assert 2 * num_k <= _OUT_LANES

    itemsize = jnp.dtype(x2.dtype).itemsize
    chunk = 8 * max(1, 4 // itemsize)      # 8 rows for f32, 16 for bf16 (native tiles)
    l_pad = _round_up(l, 128)              # lane-dense vregs; padded lanes masked in-kernel
    tr, r_pad = _choose_row_tile(r, l_pad, itemsize, chunk)

    if (r_pad, l_pad) != (r, l):
        # Padded rows have x == y (contribute exactly 0); padded lanes are masked.
        x2 = jnp.pad(x2, ((0, r_pad - r), (0, l_pad - l)))
        y2 = jnp.pad(y2, ((0, r_pad - r), (0, l_pad - l)))

    grid = (r_pad // tr,)
    num_chunks = tr // chunk
    unroll = num_chunks if num_chunks <= 8 else 4

    # TODO(synk): for very long sequences (L in the tens of thousands) add lane-axis
    # tiling with a (k_max - 1) halo; today the whole lane axis is kept per chunk.
    partials = pl.pallas_call(
        functools.partial(_fused_profile_kernel, exps=tuple(exps), chunk=chunk,
                          valid_len=l, unroll=unroll),
        out_shape=jax.ShapeDtypeStruct((grid[0], _OUT_SUBLANES, _OUT_LANES), jnp.float32),
        grid_spec=pltpu.PrefetchScalarGridSpec(
            num_scalar_prefetch=0,
            grid=grid,
            in_specs=[
                pl.BlockSpec((tr, l_pad), lambda i: (i, 0)),
                pl.BlockSpec((tr, l_pad), lambda i: (i, 0)),
            ],
            out_specs=pl.BlockSpec((1, _OUT_SUBLANES, _OUT_LANES), lambda i: (i, 0, 0)),
        ),
        compiler_params=pltpu.CompilerParams(
            dimension_semantics=("parallel",),       # row tiles independent -> megacore split
            vmem_limit_bytes=40 * 1024 * 1024,       # > v5e's 16 MiB default, < v7x's 64 MiB physical
        ),
    )(x2, y2)
    return jnp.sum(partials, axis=(0, 1))            # (_OUT_LANES,)


def feature_profile_loss(x, y, kernel_sizes=(2, 3, 4, 5, 6, 7)):
    """Pallas equivalent of FeatureProfileLoss.forward(input, target).

    x, y: (B, C, L) float arrays (f32 or bf16 — the kernel upcasts to f32 internally,
    so bandwidth-poor v5e callers can halve HBM traffic by passing bf16).
    Returns (10 * entropy_loss, content_loss).
    """
    b, c, l = x.shape
    r = b * c
    exps = tuple(sorted({int(e) for e in kernel_sizes}))
    assert exps and exps[0] >= 0
    assert l >= (1 << exps[-1]), "signal length must be >= largest kernel size"

    sums = _profile_partials(x.reshape(r, l), y.reshape(r, l), exps)

    ent_loss = jnp.float32(0.0)
    con_loss = jnp.float32(0.0)
    for e in kernel_sizes:                           # original order (duplicates behave like PyTorch)
        e = int(e)
        k = 1 << e
        idx = exps.index(e)
        n = r * (l - k + 1)                          # true element count (padding excluded)
        ent_loss = ent_loss + sums[2 * idx] / n      # L1 mean
        con_loss = con_loss + sums[2 * idx + 1] / n  # MSE mean
    return 10.0 * ent_loss, con_loss


def _reference(x, y, kernel_sizes):
    """Pure-JAX reference matching the PyTorch module semantics."""
    ent_total = jnp.float32(0.0)
    con_total = jnp.float32(0.0)
    for e in kernel_sizes:
        k = 2 ** int(e)

        def prof(v, k=k):
            l = v.shape[-1]
            w = l - k + 1
            idx = jnp.arange(w)[:, None] + jnp.arange(k)[None, :]    # (W, k)
            t = v[:, :, idx]                                         # (B, C, W, k)
            p = jax.nn.softmax(t, axis=-1)
            lp = jax.nn.log_softmax(t, axis=-1)
            return jnp.mean(p * lp, axis=-1), jnp.mean(t, axis=-1)

        ei, ci = prof(x)
        et, ct = prof(y)
        ent_total = ent_total + jnp.mean(jnp.abs(ei - et))
        con_total = con_total + jnp.mean((ci - ct) ** 2)
    return 10.0 * ent_total, con_total


if __name__ == "__main__":
    kernel_sizes = (2, 3, 4, 5, 6, 7)                # k = 4 .. 128 (module default)
    B, C, L = 2, 3, 256

    key = jax.random.PRNGKey(0)
    kx, ky = jax.random.split(key)
    x = jax.random.normal(kx, (B, C, L), dtype=jnp.float32)
    y = jax.random.normal(ky, (B, C, L), dtype=jnp.float32)

    ent_loss, con_loss = feature_profile_loss(x, y, kernel_sizes)
    ent_loss = jax.block_until_ready(ent_loss)
    con_loss = jax.block_until_ready(con_loss)

    ent_ref, con_ref = _reference(x, y, kernel_sizes)
    np.testing.assert_allclose(np.asarray(ent_loss), np.asarray(ent_ref), rtol=1e-4, atol=1e-5)
    np.testing.assert_allclose(np.asarray(con_loss), np.asarray(con_ref), rtol=1e-4, atol=1e-5)

    print("KERNEL_OK")
</pallas_src>

<mosaic_0001>
module attributes {stable_mosaic.version = 11 : i64} {
  func.func @_fused_profile_kernel(%arg0: i32, %arg1: memref<8x256xf32, #tpu.memory_space<vmem>>, %arg2: memref<8x256xf32, #tpu.memory_space<vmem>>, %arg3: memref<1x8x128xf32, #tpu.memory_space<vmem>>) attributes {dimension_semantics = [#tpu.dimension_semantics<parallel>], iteration_bounds = array<i64: 1>, scalar_prefetch = 0 : i64, scratch_operands = 0 : i64, tpu.core_type = #tpu.core_type<tc>, window_params = [{transform_indices = @transform_0, window_bounds = array<i64: 8, 256>}, {transform_indices = @transform_1, window_bounds = array<i64: 8, 256>}, {transform_indices = @transform_2, window_bounds = array<i64: 1, 8, 128>}]} {
    %0 = tpu.iota {dimensions = array<i32: 1>} : vector<8x256xi32>
    %1 = tpu.iota {dimensions = array<i32: 0>} : vector<8x128xi32>
    %2 = tpu.iota {dimensions = array<i32: 1>} : vector<8x128xi32>
    %c253_i32 = arith.constant 253 : i32
    %3 = vector.broadcast %c253_i32 : i32 to vector<8x256xi32>
    %4 = arith.cmpi slt, %0, %3 : vector<8x256xi32>
    %c249_i32 = arith.constant 249 : i32
    %5 = vector.broadcast %c249_i32 : i32 to vector<8x256xi32>
    %6 = arith.cmpi slt, %0, %5 : vector<8x256xi32>
    %c241_i32 = arith.constant 241 : i32
    %7 = vector.broadcast %c241_i32 : i32 to vector<8x256xi32>
    %8 = arith.cmpi slt, %0, %7 : vector<8x256xi32>
    %c225_i32 = arith.constant 225 : i32
    %9 = vector.broadcast %c225_i32 : i32 to vector<8x256xi32>
    %10 = arith.cmpi slt, %0, %9 : vector<8x256xi32>
    %c193_i32 = arith.constant 193 : i32
    %11 = vector.broadcast %c193_i32 : i32 to vector<8x256xi32>
    %12 = arith.cmpi slt, %0, %11 : vector<8x256xi32>
    %c129_i32 = arith.constant 129 : i32
    %13 = vector.broadcast %c129_i32 : i32 to vector<8x256xi32>
    %14 = arith.cmpi slt, %0, %13 : vector<8x256xi32>
    %cst = arith.constant 0.000000e+00 : f32
    %15 = vector.broadcast %cst : f32 to vector<8x128xf32>
    %cst_0 = arith.constant 1.000000e-30 : f32
    %c0_i32 = arith.constant 0 : i32
    %c8_i32 = arith.constant 8 : i32
    %16 = arith.muli %c0_i32, %c8_i32 : i32
    %17 = tpu.assume_multiple %16, 8 : i32
    %18 = arith.index_cast %17 : i32 to index
    %c0 = arith.constant 0 : index
    %19 = vector.load %arg1[%18, %c0] : memref<8x256xf32, #tpu.memory_space<vmem>>, vector<8x256xf32>
    %20 = arith.index_cast %17 : i32 to index
    %c0_1 = arith.constant 0 : index
    %21 = vector.load %arg2[%20, %c0_1] : memref<8x256xf32, #tpu.memory_space<vmem>>, vector<8x256xf32>
    %cst_2 = arith.constant dense<0xFF800000> : vector<8xf32>
    %22 = vector.multi_reduction <maximumf>, %19, %cst_2 [1] : vector<8x256xf32> to vector<8xf32>
    %23 = vector.shape_cast %22 : vector<8xf32> to vector<8x1xf32>
    %cst_3 = arith.constant dense<0xFF800000> : vector<8xf32>
    %24 = vector.multi_reduction <maximumf>, %21, %cst_3 [1] : vector<8x256xf32> to vector<8xf32>
    %25 = vector.shape_cast %24 : vector<8xf32> to vector<8x1xf32>
    %26 = arith.subf %23, %25 : vector<8x1xf32>
    %27 = vector.broadcast %23 : vector<8x1xf32> to vector<8x256xf32>
    %28 = arith.subf %19, %27 : vector<8x256xf32>
    %29 = math.exp %28 : vector<8x256xf32>
    %30 = vector.broadcast %25 : vector<8x1xf32> to vector<8x256xf32>
    %31 = arith.subf %21, %30 : vector<8x256xf32>
    %32 = math.exp %31 : vector<8x256xf32>
    %33 = arith.mulf %29, %19 : vector<8x256xf32>
    %34 = arith.mulf %32, %21 : vector<8x256xf32>
    %35 = arith.subf %19, %21 : vector<8x256xf32>
    %cst_4 = arith.constant 0.000000e+00 : f32
    %36 = vector.broadcast %cst_4 : f32 to vector<8x128xf32>
    %c255_i32 = arith.constant 255 : i32
    %37 = tpu.dynamic_rotate %29 by %c255_i32 dim 1 : vector<8x256xf32>, i32 -> vector<8x256xf32>
    %38 = arith.addf %29, %37 : vector<8x256xf32>
    %c255_i32_5 = arith.constant 255 : i32
    %39 = tpu.dynamic_rotate %33 by %c255_i32_5 dim 1 : vector<8x256xf32>, i32 -> vector<8x256xf32>
    %40 = arith.addf %33, %39 : vector<8x256xf32>
    %c255_i32_6 = arith.constant 255 : i32
    %41 = tpu.dynamic_rotate %32 by %c255_i32_6 dim 1 : vector<8x256xf32>, i32 -> vector<8x256xf32>
    %42 = arith.addf %32, %41 : vector<8x256xf32>
    %c255_i32_7 = arith.constant 255 : i32
    %43 = tpu.dynamic_rotate %34 by %c255_i32_7 dim 1 : vector<8x256xf32>, i32 -> vector<8x256xf32>
    %44 = arith.addf %34, %43 : vector<8x256xf32>
    %c255_i32_8 = arith.constant 255 : i32
    %45 = tpu.dynamic_rotate %35 by %c255_i32_8 dim 1 : vector<8x256xf32>, i32 -> vector<8x256xf32>
    %46 = arith.addf %35, %45 : vector<8x256xf32>
    %c254_i32 = arith.constant 254 : i32
    %47 = tpu.dynamic_rotate %38 by %c254_i32 dim 1 : vector<8x256xf32>, i32 -> vector<8x256xf32>
    %48 = arith.addf %38, %47 : vector<8x256xf32>
    %c254_i32_9 = arith.constant 254 : i32
    %49 = tpu.dynamic_rotate %40 by %c254_i32_9 dim 1 : vector<8x256xf32>, i32 -> vector<8x256xf32>
    %50 = arith.addf %40, %49 : vector<8x256xf32>
    %c254_i32_10 = arith.constant 254 : i32
    %51 = tpu.dynamic_rotate %42 by %c254_i32_10 dim 1 : vector<8x256xf32>, i32 -> vector<8x256xf32>
    %52 = arith.addf %42, %51 : vector<8x256xf32>
    %c254_i32_11 = arith.constant 254 : i32
    %53 = tpu.dynamic_rotate %44 by %c254_i32_11 dim 1 : vector<8x256xf32>, i32 -> vector<8x256xf32>
    %54 = arith.addf %44, %53 : vector<8x256xf32>
    %c254_i32_12 = arith.constant 254 : i32
    %55 = tpu.dynamic_rotate %46 by %c254_i32_12 dim 1 : vector<8x256xf32>, i32 -> vector<8x256xf32>
    %56 = arith.addf %46, %55 : vector<8x256xf32>
    %57 = vector.broadcast %cst_0 : f32 to vector<8x256xf32>
    %58 = arith.maximumf %48, %57 : vector<8x256xf32>
    %59 = vector.broadcast %cst_0 : f32 to vector<8x256xf32>
    %60 = arith.maximumf %52, %59 : vector<8x256xf32>
    %cst_13 = arith.constant 1.000000e+00 : f32
    %61 = vector.broadcast %cst_13 : f32 to vector<8x256xf32>
    %62 = arith.divf %61, %58 : vector<8x256xf32>
    %cst_14 = arith.constant 1.000000e+00 : f32
    %63 = vector.broadcast %cst_14 : f32 to vector<8x256xf32>
    %64 = arith.divf %63, %60 : vector<8x256xf32>
    %65 = arith.mulf %50, %62 : vector<8x256xf32>
    %66 = arith.mulf %54, %64 : vector<8x256xf32>
    %67 = arith.subf %65, %66 : vector<8x256xf32>
    %68 = vector.broadcast %26 : vector<8x1xf32> to vector<8x256xf32>
    %69 = arith.subf %67, %68 : vector<8x256xf32>
    %70 = arith.mulf %58, %64 : vector<8x256xf32>
    %71 = math.log %70 : vector<8x256xf32>
    %72 = arith.subf %69, %71 : vector<8x256xf32>
    %73 = math.absf %72 : vector<8x256xf32>
    %cst_15 = arith.constant 0.000000e+00 : f32
    %74 = vector.broadcast %cst_15 : f32 to vector<8x256xf32>
    %75 = arith.select %4, %73, %74 : vector<8x256xi1>, vector<8x256xf32>
    %76 = vector.shape_cast %75 : vector<8x256xf32> to vector<1x8x256xf32>
    %cst_16 = arith.constant dense<0.000000e+00> : vector<1xf32>
    %77 = vector.multi_reduction <add>, %76, %cst_16 [1, 2] : vector<1x8x256xf32> to vector<1xf32>
    %78 = vector.shape_cast %77 : vector<1xf32> to vector<1x1x1xf32>
    %79 = vector.extract %78[0, 0, 0] : f32 from vector<1x1x1xf32>
    %cst_17 = arith.constant 4.000000e+00 : f32
    %80 = arith.divf %79, %cst_17 : f32
    %81 = arith.mulf %56, %56 : vector<8x256xf32>
    %cst_18 = arith.constant 0.000000e+00 : f32
    %82 = vector.broadcast %cst_18 : f32 to vector<8x256xf32>
    %83 = arith.select %4, %81, %82 : vector<8x256xi1>, vector<8x256xf32>
    %84 = vector.shape_cast %83 : vector<8x256xf32> to vector<1x8x256xf32>
    %cst_19 = arith.constant dense<0.000000e+00> : vector<1xf32>
    %85 = vector.multi_reduction <add>, %84, %cst_19 [1, 2] : vector<1x8x256xf32> to vector<1xf32>
    %86 = vector.shape_cast %85 : vector<1xf32> to vector<1x1x1xf32>
    %87 = vector.extract %86[0, 0, 0] : f32 from vector<1x1x1xf32>
    %cst_20 = arith.constant 1.600000e+01 : f32
    %88 = arith.divf %87, %cst_20 : f32
    %c0_i32_21 = arith.constant 0 : i32
    %89 = vector.broadcast %c0_i32_21 : i32 to vector<8x128xi32>
    %90 = arith.cmpi eq, %1, %89 : vector<8x128xi32>
    %c0_i32_22 = arith.constant 0 : i32
    %91 = vector.broadcast %c0_i32_22 : i32 to vector<8x128xi32>
    %92 = arith.cmpi eq, %2, %91 : vector<8x128xi32>
    %93 = arith.andi %90, %92 : vector<8x128xi1>
    %cst_23 = arith.constant 0.000000e+00 : f32
    %94 = vector.broadcast %80 : f32 to vector<8x128xf32>
    %95 = vector.broadcast %cst_23 : f32 to vector<8x128xf32>
    %96 = arith.select %93, %94, %95 : vector<8x128xi1>, vector<8x128xf32>
    %97 = arith.addf %36, %96 : vector<8x128xf32>
    %c0_i32_24 = arith.constant 0 : i32
    %98 = vector.broadcast %c0_i32_24 : i32 to vector<8x128xi32>
    %99 = arith.cmpi eq, %1, %98 : vector<8x128xi32>
    %c1_i32 = arith.constant 1 : i32
    %100 = vector.broadcast %c1_i32 : i32 to vector<8x128xi32>
    %101 = arith.cmpi eq, %2, %100 : vector<8x128xi32>
    %102 = arith.andi %99, %101 : vector<8x128xi1>
    %cst_25 = arith.constant 0.000000e+00 : f32
    %103 = vector.broadcast %88 : f32 to vector<8x128xf32>
    %104 = vector.broadcast %cst_25 : f32 to vector<8x128xf32>
    %105 = arith.select %102, %103, %104 : vector<8x128xi1>, vector<8x128xf32>
    %106 = arith.addf %97, %105 : vector<8x128xf32>
    %c252_i32 = arith.constant 252 : i32
    %107 = tpu.dynamic_rotate %48 by %c252_i32 dim 1 : vector<8x256xf32>, i32 -> vector<8x256xf32>
    %108 = arith.addf %48, %107 : vector<8x256xf32>
    %c252_i32_26 = arith.constant 252 : i32
    %109 = tpu.dynamic_rotate %50 by %c252_i32_26 dim 1 : vector<8x256xf32>, i32 -> vector<8x256xf32>
    %110 = arith.addf %50, %109 : vector<8x256xf32>
    %c252_i32_27 = arith.constant 252 : i32
    %111 = tpu.dynamic_rotate %52 by %c252_i32_27 dim 1 : vector<8x256xf32>, i32 -> vector<8x256xf32>
    %112 = arith.addf %52, %111 : vector<8x256xf32>
    %c252_i32_28 = arith.constant 252 : i32
    %113 = tpu.dynamic_rotate %54 by %c252_i32_28 dim 1 : vector<8x256xf32>, i32 -> vector<8x256xf32>
    %114 = arith.addf %54, %113 : vector<8x256xf32>
    %c252_i32_29 = arith.constant 252 : i32
    %115 = tpu.dynamic_rotate %56 by %c252_i32_29 dim 1 : vector<8x256xf32>, i32 -> vector<8x256xf32>
    %116 = arith.addf %56, %115 : vector<8x256xf32>
    %117 = vector.broadcast %cst_0 : f32 to vector<8x256xf32>
    %118 = arith.maximumf %108, %117 : vector<8x256xf32>
    %119 = vector.broadcast %cst_0 : f32 to vector<8x256xf32>
    %120 = arith.maximumf %112, %119 : vector<8x256xf32>
    %cst_30 = arith.constant 1.000000e+00 : f32
    %121 = vector.broadcast %cst_30 : f32 to vector<8x256xf32>
    %122 = arith.divf %121, %118 : vector<8x256xf32>
    %cst_31 = arith.constant 1.000000e+00 : f32
    %123 = vector.broadcast %cst_31 : f32 to vector<8x256xf32>
    %124 = arith.divf %123, %120 : vector<8x256xf32>
    %125 = arith.mulf %110, %122 : vector<8x256xf32>
    %126 = arith.mulf %114, %124 : vector<8x256xf32>
    %127 = arith.subf %125, %126 : vector<8x256xf32>
    %128 = vector.broadcast %26 : vector<8x1xf32> to vector<8x256xf32>
    %129 = arith.subf %127, %128 : vector<8x256xf32>
    %130 = arith.mulf %118, %124 : vector<8x256xf32>
    %131 = math.log %130 : vector<8x256xf32>
    %132 = arith.subf %129, %131 : vector<8x256xf32>
    %133 = math.absf %132 : vector<8x256xf32>
    %cst_32 = arith.constant 0.000000e+00 : f32
    %134 = vector.broadcast %cst_32 : f32 to vector<8x256xf32>
    %135 = arith.select %6, %133, %134 : vector<8x256xi1>, vector<8x256xf32>
    %136 = vector.shape_cast %135 : vector<8x256xf32> to vector<1x8x256xf32>
    %cst_33 = arith.constant dense<0.000000e+00> : vector<1xf32>
    %137 = vector.multi_reduction <add>, %136, %cst_33 [1, 2] : vector<1x8x256xf32> to vector<1xf32>
    %138 = vector.shape_cast %137 : vector<1xf32> to vector<1x1x1xf32>
    %139 = vector.extract %138[0, 0, 0] : f32 from vector<1x1x1xf32>
    %cst_34 = arith.constant 8.000000e+00 : f32
    %140 = arith.divf %139, %cst_34 : f32
    %141 = arith.mulf %116, %116 : vector<8x256xf32>
    %cst_35 = arith.constant 0.000000e+00 : f32
    %142 = vector.broadcast %cst_35 : f32 to vector<8x256xf32>
    %143 = arith.select %6, %141, %142 : vector<8x256xi1>, vector<8x256xf32>
    %144 = vector.shape_cast %143 : vector<8x256xf32> to vector<1x8x256xf32>
    %cst_36 = arith.constant dense<0.000000e+00> : vector<1xf32>
    %145 = vector.multi_reduction <add>, %144, %cst_36 [1, 2] : vector<1x8x256xf32> to vector<1xf32>
    %146 = vector.shape_cast %145 : vector<1xf32> to vector<1x1x1xf32>
    %147 = vector.extract %146[0, 0, 0] : f32 from vector<1x1x1xf32>
    %cst_37 = arith.constant 6.400000e+01 : f32
    %148 = arith.divf %147, %cst_37 : f32
    %c0_i32_38 = arith.constant 0 : i32
    %149 = vector.broadcast %c0_i32_38 : i32 to vector<8x128xi32>
    %150 = arith.cmpi eq, %1, %149 : vector<8x128xi32>
    %c2_i32 = arith.constant 2 : i32
    %151 = vector.broadcast %c2_i32 : i32 to vector<8x128xi32>
    %152 = arith.cmpi eq, %2, %151 : vector<8x128xi32>
    %153 = arith.andi %150, %152 : vector<8x128xi1>
    %cst_39 = arith.constant 0.000000e+00 : f32
    %154 = vector.broadcast %140 : f32 to vector<8x128xf32>
    %155 = vector.broadcast %cst_39 : f32 to vector<8x128xf32>
    %156 = arith.select %153, %154, %155 : vector<8x128xi1>, vector<8x128xf32>
    %157 = arith.addf %106, %156 : vector<8x128xf32>
    %c0_i32_40 = arith.constant 0 : i32
    %158 = vector.broadcast %c0_i32_40 : i32 to vector<8x128xi32>
    %159 = arith.cmpi eq, %1, %158 : vector<8x128xi32>
    %c3_i32 = arith.constant 3 : i32
    %160 = vector.broadcast %c3_i32 : i32 to vector<8x128xi32>
    %161 = arith.cmpi eq, %2, %160 : vector<8x128xi32>
    %162 = arith.andi %159, %161 : vector<8x128xi1>
    %cst_41 = arith.constant 0.000000e+00 : f32
    %163 = vector.broadcast %148 : f32 to vector<8x128xf32>
    %164 = vector.broadcast %cst_41 : f32 to vector<8x128xf32>
    %165 = arith.select %162, %163, %164 : vector<8x128xi1>, vector<8x128xf32>
    %166 = arith.addf %157, %165 : vector<8x128xf32>
    %c248_i32 = arith.constant 248 : i32
    %167 = tpu.dynamic_rotate %108 by %c248_i32 dim 1 : vector<8x256xf32>, i32 -> vector<8x256xf32>
    %168 = arith.addf %108, %167 : vector<8x256xf32>
    %c248_i32_42 = arith.constant 248 : i32
    %169 = tpu.dynamic_rotate %110 by %c248_i32_42 dim 1 : vector<8x256xf32>, i32 -> vector<8x256xf32>
    %170 = arith.addf %110, %169 : vector<8x256xf32>
    %c248_i32_43 = arith.constant 248 : i32
    %171 = tpu.dynamic_rotate %112 by %c248_i32_43 dim 1 : vector<8x256xf32>, i32 -> vector<8x256xf32>
    %172 = arith.addf %112, %171 : vector<8x256xf32>
    %c248_i32_44 = arith.constant 248 : i32
    %173 = tpu.dynamic_rotate %114 by %c248_i32_44 dim 1 : vector<8x256xf32>, i32 -> vector<8x256xf32>
    %174 = arith.addf %114, %173 : vector<8x256xf32>
    %c248_i32_45 = arith.constant 248 : i32
    %175 = tpu.dynamic_rotate %116 by %c248_i32_45 dim 1 : vector<8x256xf32>, i32 -> vector<8x256xf32>
    %176 = arith.addf %116, %175 : vector<8x256xf32>
    %177 = vector.broadcast %cst_0 : f32 to vector<8x256xf32>
    %178 = arith.maximumf %168, %177 : vector<8x256xf32>
    %179 = vector.broadcast %cst_0 : f32 to vector<8x256xf32>
    %180 = arith.maximumf %172, %179 : vector<8x256xf32>
    %cst_46 = arith.constant 1.000000e+00 : f32
    %181 = vector.broadcast %cst_46 : f32 to vector<8x256xf32>
    %182 = arith.divf %181, %178 : vector<8x256xf32>
    %cst_47 = arith.constant 1.000000e+00 : f32
    %183 = vector.broadcast %cst_47 : f32 to vector<8x256xf32>
    %184 = arith.divf %183, %180 : vector<8x256xf32>
    %185 = arith.mulf %170, %182 : vector<8x256xf32>
    %186 = arith.mulf %174, %184 : vector<8x256xf32>
    %187 = arith.subf %185, %186 : vector<8x256xf32>
    %188 = vector.broadcast %26 : vector<8x1xf32> to vector<8x256xf32>
    %189 = arith.subf %187, %188 : vector<8x256xf32>
    %190 = arith.mulf %178, %184 : vector<8x256xf32>
    %191 = math.log %190 : vector<8x256xf32>
    %192 = arith.subf %189, %191 : vector<8x256xf32>
    %193 = math.absf %192 : vector<8x256xf32>
    %cst_48 = arith.constant 0.000000e+00 : f32
    %194 = vector.broadcast %cst_48 : f32 to vector<8x256xf32>
    %195 = arith.select %8, %193, %194 : vector<8x256xi1>, vector<8x256xf32>
    %196 = vector.shape_cast %195 : vector<8x256xf32> to vector<1x8x256xf32>
    %cst_49 = arith.constant dense<0.000000e+00> : vector<1xf32>
    %197 = vector.multi_reduction <add>, %196, %cst_49 [1, 2] : vector<1x8x256xf32> to vector<1xf32>
    %198 = vector.shape_cast %197 : vector<1xf32> to vector<1x1x1xf32>
    %199 = vector.extract %198[0, 0, 0] : f32 from vector<1x1x1xf32>
    %cst_50 = arith.constant 1.600000e+01 : f32
    %200 = arith.divf %199, %cst_50 : f32
    %201 = arith.mulf %176, %176 : vector<8x256xf32>
    %cst_51 = arith.constant 0.000000e+00 : f32
    %202 = vector.broadcast %cst_51 : f32 to vector<8x256xf32>
    %203 = arith.select %8, %201, %202 : vector<8x256xi1>, vector<8x256xf32>
    %204 = vector.shape_cast %203 : vector<8x256xf32> to vector<1x8x256xf32>
    %cst_52 = arith.constant dense<0.000000e+00> : vector<1xf32>
    %205 = vector.multi_reduction <add>, %204, %cst_52 [1, 2] : vector<1x8x256xf32> to vector<1xf32>
    %206 = vector.shape_cast %205 : vector<1xf32> to vector<1x1x1xf32>
    %207 = vector.extract %206[0, 0, 0] : f32 from vector<1x1x1xf32>
    %cst_53 = arith.constant 2.560000e+02 : f32
    %208 = arith.divf %207, %cst_53 : f32
    %c0_i32_54 = arith.constant 0 : i32
    %209 = vector.broadcast %c0_i32_54 : i32 to vector<8x128xi32>
    %210 = arith.cmpi eq, %1, %209 : vector<8x128xi32>
    %c4_i32 = arith.constant 4 : i32
    %211 = vector.broadcast %c4_i32 : i32 to vector<8x128xi32>
    %212 = arith.cmpi eq, %2, %211 : vector<8x128xi32>
    %213 = arith.andi %210, %212 : vector<8x128xi1>
    %cst_55 = arith.constant 0.000000e+00 : f32
    %214 = vector.broadcast %200 : f32 to vector<8x128xf32>
    %215 = vector.broadcast %cst_55 : f32 to vector<8x128xf32>
    %216 = arith.select %213, %214, %215 : vector<8x128xi1>, vector<8x128xf32>
    %217 = arith.addf %166, %216 : vector<8x128xf32>
    %c0_i32_56 = arith.constant 0 : i32
    %218 = vector.broadcast %c0_i32_56 : i32 to vector<8x128xi32>
    %219 = arith.cmpi eq, %1, %218 : vector<8x128xi32>
    %c5_i32 = arith.constant 5 : i32
    %220 = vector.broadcast %c5_i32 : i32 to vector<8x128xi32>
    %221 = arith.cmpi eq, %2, %220 : vector<8x128xi32>
    %222 = arith.andi %219, %221 : vector<8x128xi1>
    %cst_57 = arith.constant 0.000000e+00 : f32
    %223 = vector.broadcast %208 : f32 to vector<8x128xf32>
    %224 = vector.broadcast %cst_57 : f32 to vector<8x128xf32>
    %225 = arith.select %222, %223, %224 : vector<8x128xi1>, vector<8x128xf32>
    %226 = arith.addf %217, %225 : vector<8x128xf32>
    %c240_i32 = arith.constant 240 : i32
    %227 = tpu.dynamic_rotate %168 by %c240_i32 dim 1 : vector<8x256xf32>, i32 -> vector<8x256xf32>
    %228 = arith.addf %168, %227 : vector<8x256xf32>
    %c240_i32_58 = arith.constant 240 : i32
    %229 = tpu.dynamic_rotate %170 by %c240_i32_58 dim 1 : vector<8x256xf32>, i32 -> vector<8x256xf32>
    %230 = arith.addf %170, %229 : vector<8x256xf32>
    %c240_i32_59 = arith.constant 240 : i32
    %231 = tpu.dynamic_rotate %172 by %c240_i32_59 dim 1 : vector<8x256xf32>, i32 -> vector<8x256xf32>
    %232 = arith.addf %172, %231 : vector<8x256xf32>
    %c240_i32_60 = arith.constant 240 : i32
    %233 = tpu.dynamic_rotate %174 by %c240_i32_60 dim 1 : vector<8x256xf32>, i32 -> vector<8x256xf32>
    %234 = arith.addf %174, %233 : vector<8x256xf32>
    %c240_i32_61 = arith.constant 240 : i32
    %235 = tpu.dynamic_rotate %176 by %c240_i32_61 dim 1 : vector<8x256xf32>, i32 -> vector<8x256xf32>
    %236 = arith.addf %176, %235 : vector<8x256xf32>
    %237 = vector.broadcast %cst_0 : f32 to vector<8x256xf32>
    %238 = arith.maximumf %228, %237 : vector<8x256xf32>
    %239 = vector.broadcast %cst_0 : f32 to vector<8x256xf32>
    %240 = arith.maximumf %232, %239 : vector<8x256xf32>
    %cst_62 = arith.constant 1.000000e+00 : f32
    %241 = vector.broadcast %cst_62 : f32 to vector<8x256xf32>
    %242 = arith.divf %241, %238 : vector<8x256xf32>
    %cst_63 = arith.constant 1.000000e+00 : f32
    %243 = vector.broadcast %cst_63 : f32 to vector<8x256xf32>
    %244 = arith.divf %243, %240 : vector<8x256xf32>
    %245 = arith.mulf %230, %242 : vector<8x256xf32>
    %246 = arith.mulf %234, %244 : vector<8x256xf32>
    %247 = arith.subf %245, %246 : vector<8x256xf32>
    %248 = vector.broadcast %26 : vector<8x1xf32> to vector<8x256xf32>
    %249 = arith.subf %247, %248 : vector<8x256xf32>
    %250 = arith.mulf %238, %244 : vector<8x256xf32>
    %251 = math.log %250 : vector<8x256xf32>
    %252 = arith.subf %249, %251 : vector<8x256xf32>
    %253 = math.absf %252 : vector<8x256xf32>
    %cst_64 = arith.constant 0.000000e+00 : f32
    %254 = vector.broadcast %cst_64 : f32 to vector<8x256xf32>
    %255 = arith.select %10, %253, %254 : vector<8x256xi1>, vector<8x256xf32>
    %256 = vector.shape_cast %255 : vector<8x256xf32> to vector<1x8x256xf32>
    %cst_65 = arith.constant dense<0.000000e+00> : vector<1xf32>
    %257 = vector.multi_reduction <add>, %256, %cst_65 [1, 2] : vector<1x8x256xf32> to vector<1xf32>
    %258 = vector.shape_cast %257 : vector<1xf32> to vector<1x1x1xf32>
    %259 = vector.extract %258[0, 0, 0] : f32 from vector<1x1x1xf32>
    %cst_66 = arith.constant 3.200000e+01 : f32
    %260 = arith.divf %259, %cst_66 : f32
    %261 = arith.mulf %236, %236 : vector<8x256xf32>
    %cst_67 = arith.constant 0.000000e+00 : f32
    %262 = vector.broadcast %cst_67 : f32 to vector<8x256xf32>
    %263 = arith.select %10, %261, %262 : vector<8x256xi1>, vector<8x256xf32>
    %264 = vector.shape_cast %263 : vector<8x256xf32> to vector<1x8x256xf32>
    %cst_68 = arith.constant dense<0.000000e+00> : vector<1xf32>
    %265 = vector.multi_reduction <add>, %264, %cst_68 [1, 2] : vector<1x8x256xf32> to vector<1xf32>
    %266 = vector.shape_cast %265 : vector<1xf32> to vector<1x1x1xf32>
    %267 = vector.extract %266[0, 0, 0] : f32 from vector<1x1x1xf32>
    %cst_69 = arith.constant 1.024000e+03 : f32
    %268 = arith.divf %267, %cst_69 : f32
    %c0_i32_70 = arith.constant 0 : i32
    %269 = vector.broadcast %c0_i32_70 : i32 to vector<8x128xi32>
    %270 = arith.cmpi eq, %1, %269 : vector<8x128xi32>
    %c6_i32 = arith.constant 6 : i32
    %271 = vector.broadcast %c6_i32 : i32 to vector<8x128xi32>
    %272 = arith.cmpi eq, %2, %271 : vector<8x128xi32>
    %273 = arith.andi %270, %272 : vector<8x128xi1>
    %cst_71 = arith.constant 0.000000e+00 : f32
    %274 = vector.broadcast %260 : f32 to vector<8x128xf32>
    %275 = vector.broadcast %cst_71 : f32 to vector<8x128xf32>
    %276 = arith.select %273, %274, %275 : vector<8x128xi1>, vector<8x128xf32>
    %277 = arith.addf %226, %276 : vector<8x128xf32>
    %c0_i32_72 = arith.constant 0 : i32
    %278 = vector.broadcast %c0_i32_72 : i32 to vector<8x128xi32>
    %279 = arith.cmpi eq, %1, %278 : vector<8x128xi32>
    %c7_i32 = arith.constant 7 : i32
    %280 = vector.broadcast %c7_i32 : i32 to vector<8x128xi32>
    %281 = arith.cmpi eq, %2, %280 : vector<8x128xi32>
    %282 = arith.andi %279, %281 : vector<8x128xi1>
    %cst_73 = arith.constant 0.000000e+00 : f32
    %283 = vector.broadcast %268 : f32 to vector<8x128xf32>
    %284 = vector.broadcast %cst_73 : f32 to vector<8x128xf32>
    %285 = arith.select %282, %283, %284 : vector<8x128xi1>, vector<8x128xf32>
    %286 = arith.addf %277, %285 : vector<8x128xf32>
    %c224_i32 = arith.constant 224 : i32
    %287 = tpu.dynamic_rotate %228 by %c224_i32 dim 1 : vector<8x256xf32>, i32 -> vector<8x256xf32>
    %288 = arith.addf %228, %287 : vector<8x256xf32>
    %c224_i32_74 = arith.constant 224 : i32
    %289 = tpu.dynamic_rotate %230 by %c224_i32_74 dim 1 : vector<8x256xf32>, i32 -> vector<8x256xf32>
    %290 = arith.addf %230, %289 : vector<8x256xf32>
    %c224_i32_75 = arith.constant 224 : i32
    %291 = tpu.dynamic_rotate %232 by %c224_i32_75 dim 1 : vector<8x256xf32>, i32 -> vector<8x256xf32>
    %292 = arith.addf %232, %291 : vector<8x256xf32>
    %c224_i32_76 = arith.constant 224 : i32
    %293 = tpu.dynamic_rotate %234 by %c224_i32_76 dim 1 : vector<8x256xf32>, i32 -> vector<8x256xf32>
    %294 = arith.addf %234, %293 : vector<8x256xf32>
    %c224_i32_77 = arith.constant 224 : i32
    %295 = tpu.dynamic_rotate %236 by %c224_i32_77 dim 1 : vector<8x256xf32>, i32 -> vector<8x256xf32>
    %296 = arith.addf %236, %295 : vector<8x256xf32>
    %297 = vector.broadcast %cst_0 : f32 to vector<8x256xf32>
    %298 = arith.maximumf %288, %297 : vector<8x256xf32>
    %299 = vector.broadcast %cst_0 : f32 to vector<8x256xf32>
    %300 = arith.maximumf %292, %299 : vector<8x256xf32>
    %cst_78 = arith.constant 1.000000e+00 : f32
    %301 = vector.broadcast %cst_78 : f32 to vector<8x256xf32>
    %302 = arith.divf %301, %298 : vector<8x256xf32>
    %cst_79 = arith.constant 1.000000e+00 : f32
    %303 = vector.broadcast %cst_79 : f32 to vector<8x256xf32>
    %304 = arith.divf %303, %300 : vector<8x256xf32>
    %305 = arith.mulf %290, %302 : vector<8x256xf32>
    %306 = arith.mulf %294, %304 : vector<8x256xf32>
    %307 = arith.subf %305, %306 : vector<8x256xf32>
    %308 = vector.broadcast %26 : vector<8x1xf32> to vector<8x256xf32>
    %309 = arith.subf %307, %308 : vector<8x256xf32>
    %310 = arith.mulf %298, %304 : vector<8x256xf32>
    %311 = math.log %310 : vector<8x256xf32>
    %312 = arith.subf %309, %311 : vector<8x256xf32>
    %313 = math.absf %312 : vector<8x256xf32>
    %cst_80 = arith.constant 0.000000e+00 : f32
    %314 = vector.broadcast %cst_80 : f32 to vector<8x256xf32>
    %315 = arith.select %12, %313, %314 : vector<8x256xi1>, vector<8x256xf32>
    %316 = vector.shape_cast %315 : vector<8x256xf32> to vector<1x8x256xf32>
    %cst_81 = arith.constant dense<0.000000e+00> : vector<1xf32>
    %317 = vector.multi_reduction <add>, %316, %cst_81 [1, 2] : vector<1x8x256xf32> to vector<1xf32>
    %318 = vector.shape_cast %317 : vector<1xf32> to vector<1x1x1xf32>
    %319 = vector.extract %318[0, 0, 0] : f32 from vector<1x1x1xf32>
    %cst_82 = arith.constant 6.400000e+01 : f32
    %320 = arith.divf %319, %cst_82 : f32
    %321 = arith.mulf %296, %296 : vector<8x256xf32>
    %cst_83 = arith.constant 0.000000e+00 : f32
    %322 = vector.broadcast %cst_83 : f32 to vector<8x256xf32>
    %323 = arith.select %12, %321, %322 : vector<8x256xi1>, vector<8x256xf32>
    %324 = vector.shape_cast %323 : vector<8x256xf32> to vector<1x8x256xf32>
    %cst_84 = arith.constant dense<0.000000e+00> : vector<1xf32>
    %325 = vector.multi_reduction <add>, %324, %cst_84 [1, 2] : vector<1x8x256xf32> to vector<1xf32>
    %326 = vector.shape_cast %325 : vector<1xf32> to vector<1x1x1xf32>
    %327 = vector.extract %326[0, 0, 0] : f32 from vector<1x1x1xf32>
    %cst_85 = arith.constant 4.096000e+03 : f32
    %328 = arith.divf %327, %cst_85 : f32
    %c0_i32_86 = arith.constant 0 : i32
    %329 = vector.broadcast %c0_i32_86 : i32 to vector<8x128xi32>
    %330 = arith.cmpi eq, %1, %329 : vector<8x128xi32>
    %c8_i32_87 = arith.constant 8 : i32
    %331 = vector.broadcast %c8_i32_87 : i32 to vector<8x128xi32>
    %332 = arith.cmpi eq, %2, %331 : vector<8x128xi32>
    %333 = arith.andi %330, %332 : vector<8x128xi1>
    %cst_88 = arith.constant 0.000000e+00 : f32
    %334 = vector.broadcast %320 : f32 to vector<8x128xf32>
    %335 = vector.broadcast %cst_88 : f32 to vector<8x128xf32>
    %336 = arith.select %333, %334, %335 : vector<8x128xi1>, vector<8x128xf32>
    %337 = arith.addf %286, %336 : vector<8x128xf32>
    %c0_i32_89 = arith.constant 0 : i32
    %338 = vector.broadcast %c0_i32_89 : i32 to vector<8x128xi32>
    %339 = arith.cmpi eq, %1, %338 : vector<8x128xi32>
    %c9_i32 = arith.constant 9 : i32
    %340 = vector.broadcast %c9_i32 : i32 to vector<8x128xi32>
    %341 = arith.cmpi eq, %2, %340 : vector<8x128xi32>
    %342 = arith.andi %339, %341 : vector<8x128xi1>
    %cst_90 = arith.constant 0.000000e+00 : f32
    %343 = vector.broadcast %328 : f32 to vector<8x128xf32>
    %344 = vector.broadcast %cst_90 : f32 to vector<8x128xf32>
    %345 = arith.select %342, %343, %344 : vector<8x128xi1>, vector<8x128xf32>
    %346 = arith.addf %337, %345 : vector<8x128xf32>
    %c192_i32 = arith.constant 192 : i32
    %347 = tpu.dynamic_rotate %288 by %c192_i32 dim 1 : vector<8x256xf32>, i32 -> vector<8x256xf32>
    %348 = arith.addf %288, %347 : vector<8x256xf32>
    %c192_i32_91 = arith.constant 192 : i32
    %349 = tpu.dynamic_rotate %290 by %c192_i32_91 dim 1 : vector<8x256xf32>, i32 -> vector<8x256xf32>
    %350 = arith.addf %290, %349 : vector<8x256xf32>
    %c192_i32_92 = arith.constant 192 : i32
    %351 = tpu.dynamic_rotate %292 by %c192_i32_92 dim 1 : vector<8x256xf32>, i32 -> vector<8x256xf32>
    %352 = arith.addf %292, %351 : vector<8x256xf32>
    %c192_i32_93 = arith.constant 192 : i32
    %353 = tpu.dynamic_rotate %294 by %c192_i32_93 dim 1 : vector<8x256xf32>, i32 -> vector<8x256xf32>
    %354 = arith.addf %294, %353 : vector<8x256xf32>
    %c192_i32_94 = arith.constant 192 : i32
    %355 = tpu.dynamic_rotate %296 by %c192_i32_94 dim 1 : vector<8x256xf32>, i32 -> vector<8x256xf32>
    %356 = arith.addf %296, %355 : vector<8x256xf32>
    %357 = vector.broadcast %cst_0 : f32 to vector<8x256xf32>
    %358 = arith.maximumf %348, %357 : vector<8x256xf32>
    %359 = vector.broadcast %cst_0 : f32 to vector<8x256xf32>
    %360 = arith.maximumf %352, %359 : vector<8x256xf32>
    %cst_95 = arith.constant 1.000000e+00 : f32
    %361 = vector.broadcast %cst_95 : f32 to vector<8x256xf32>
    %362 = arith.divf %361, %358 : vector<8x256xf32>
    %cst_96 = arith.constant 1.000000e+00 : f32
    %363 = vector.broadcast %cst_96 : f32 to vector<8x256xf32>
    %364 = arith.divf %363, %360 : vector<8x256xf32>
    %365 = arith.mulf %350, %362 : vector<8x256xf32>
    %366 = arith.mulf %354, %364 : vector<8x256xf32>
    %367 = arith.subf %365, %366 : vector<8x256xf32>
    %368 = vector.broadcast %26 : vector<8x1xf32> to vector<8x256xf32>
    %369 = arith.subf %367, %368 : vector<8x256xf32>
    %370 = arith.mulf %358, %364 : vector<8x256xf32>
    %371 = math.log %370 : vector<8x256xf32>
    %372 = arith.subf %369, %371 : vector<8x256xf32>
    %373 = math.absf %372 : vector<8x256xf32>
    %cst_97 = arith.constant 0.000000e+00 : f32
    %374 = vector.broadcast %cst_97 : f32 to vector<8x256xf32>
    %375 = arith.select %14, %373, %374 : vector<8x256xi1>, vector<8x256xf32>
    %376 = vector.shape_cast %375 : vector<8x256xf32> to vector<1x8x256xf32>
    %cst_98 = arith.constant dense<0.000000e+00> : vector<1xf32>
    %377 = vector.multi_reduction <add>, %376, %cst_98 [1, 2] : vector<1x8x256xf32> to vector<1xf32>
    %378 = vector.shape_cast %377 : vector<1xf32> to vector<1x1x1xf32>
    %379 = vector.extract %378[0, 0, 0] : f32 from vector<1x1x1xf32>
    %cst_99 = arith.constant 1.280000e+02 : f32
    %380 = arith.divf %379, %cst_99 : f32
    %381 = arith.mulf %356, %356 : vector<8x256xf32>
    %cst_100 = arith.constant 0.000000e+00 : f32
    %382 = vector.broadcast %cst_100 : f32 to vector<8x256xf32>
    %383 = arith.select %14, %381, %382 : vector<8x256xi1>, vector<8x256xf32>
    %384 = vector.shape_cast %383 : vector<8x256xf32> to vector<1x8x256xf32>
    %cst_101 = arith.constant dense<0.000000e+00> : vector<1xf32>
    %385 = vector.multi_reduction <add>, %384, %cst_101 [1, 2] : vector<1x8x256xf32> to vector<1xf32>
    %386 = vector.shape_cast %385 : vector<1xf32> to vector<1x1x1xf32>
    %387 = vector.extract %386[0, 0, 0] : f32 from vector<1x1x1xf32>
    %cst_102 = arith.constant 1.638400e+04 : f32
    %388 = arith.divf %387, %cst_102 : f32
    %c0_i32_103 = arith.constant 0 : i32
    %389 = vector.broadcast %c0_i32_103 : i32 to vector<8x128xi32>
    %390 = arith.cmpi eq, %1, %389 : vector<8x128xi32>
    %c10_i32 = arith.constant 10 : i32
    %391 = vector.broadcast %c10_i32 : i32 to vector<8x128xi32>
    %392 = arith.cmpi eq, %2, %391 : vector<8x128xi32>
    %393 = arith.andi %390, %392 : vector<8x128xi1>
    %cst_104 = arith.constant 0.000000e+00 : f32
    %394 = vector.broadcast %380 : f32 to vector<8x128xf32>
    %395 = vector.broadcast %cst_104 : f32 to vector<8x128xf32>
    %396 = arith.select %393, %394, %395 : vector<8x128xi1>, vector<8x128xf32>
    %397 = arith.addf %346, %396 : vector<8x128xf32>
    %c0_i32_105 = arith.constant 0 : i32
    %398 = vector.broadcast %c0_i32_105 : i32 to vector<8x128xi32>
    %399 = arith.cmpi eq, %1, %398 : vector<8x128xi32>
    %c11_i32 = arith.constant 11 : i32
    %400 = vector.broadcast %c11_i32 : i32 to vector<8x128xi32>
    %401 = arith.cmpi eq, %2, %400 : vector<8x128xi32>
    %402 = arith.andi %399, %401 : vector<8x128xi1>
    %cst_106 = arith.constant 0.000000e+00 : f32
    %403 = vector.broadcast %388 : f32 to vector<8x128xf32>
    %404 = vector.broadcast %cst_106 : f32 to vector<8x128xf32>
    %405 = arith.select %402, %403, %404 : vector<8x128xi1>, vector<8x128xf32>
    %406 = arith.addf %397, %405 : vector<8x128xf32>
    %407 = arith.addf %15, %406 : vector<8x128xf32>
    %c1_i32_107 = arith.constant 1 : i32
    %408 = vector.shape_cast %407 : vector<8x128xf32> to vector<1x8x128xf32>
    %c0_108 = arith.constant 0 : index
    %c0_109 = arith.constant 0 : index
    %c0_110 = arith.constant 0 : index
    %409 = vector.load %arg3[%c0_108, %c0_109, %c0_110] : memref<1x8x128xf32, #tpu.memory_space<vmem>>, vector<1x8x128xf32>
    tpu.vector_store %arg3[%c0_108, %c0_109, %c0_110], %408 {strides = array<i32>} : memref<1x8x128xf32, #tpu.memory_space<vmem>>, vector<1x8x128xf32>,
    return
  }
  func.func @transform_0(%arg0: i32) -> (i32, i32) {
    %c0_i32 = arith.constant 0 : i32
    %c0_i32_0 = arith.constant 0 : i32
    return %arg0, %c0_i32 : i32, i32
  }
  func.func @transform_1(%arg0: i32) -> (i32, i32) {
    %c0_i32 = arith.constant 0 : i32
    %c0_i32_0 = arith.constant 0 : i32
    return %arg0, %c0_i32 : i32, i32
  }
  func.func @transform_2(%arg0: i32) -> (i32, i32, i32) {
    %c0_i32 = arith.constant 0 : i32
    %c0_i32_0 = arith.constant 0 : i32
    %c0_i32_1 = arith.constant 0 : i32
    return %arg0, %c0_i32, %c0_i32_0 : i32, i32, i32
  }
}

</mosaic_0001>

<bundles_post_ra>
// kernel: tpu_custom_call.1
= control target key start
LH: loop header
LB: loop body
LE: loop exit
PB: predicated region body
PF: predicated region fallthrough
CT: control target
= control target key end

     0   :  { %7 = vsyncpa [#allocation3], 0  ;;  %s1651_s0 = inlined_call_operand.hbm [shape: f32[8,256], index: 0, kind: input, shape index: {}]   ;;  %s1652_s1 = inlined_call_operand.hbm [shape: f32[8,256], index: 1, kind: input, shape index: {}]   ;;  %s1653_s2 = inlined_call_operand.hbm [shape: f32[1,8,128], index: 2, kind: output, shape index: {}]  }
   0x1   :  { %8 = vsyncpa [#allocation6], 0 }
   0x2   :  { %9 = vsyncpa [#allocation4], 0  ;;  %s1011_s9 = smov [#allocation2]   ;;  %s1012_s11 = smov [#allocation5]  }
   0x3   :  { %s16_s10 = sshll.u32 %s1011_s9, 4  ;;  %s26_s12 = sshll.u32 %s1012_s11, 4  ;;  %s17_s10 = int_to_ptr.vmem [resolvable:$true] %s16_s10  ;;  %s27_s12 = int_to_ptr.vmem [resolvable:$true] %s26_s12 }
   0x4   :  { %s939_s15 = scalar_lea.hbm %s1651_s0, 256 }
   0x5   :  { %p940_p0 = scmp.ne.s32.totalorder %s1651_s0, %s939_s15  ;;  %p943_p1 = scmp.lt.u32.totalorder %s939_s15, %s1651_s0 }
   0x7   :  { %p945_p2 = pnand %p943_p1, %p940_p0 }
   0x9   :  { %948 = shalt.err (!%p945_p2)
}
   0xa   :  { %s949_s20 = scalar_lea.vmem %s17_s10, 256  ;;  %p954_p4 = scmp.lt.s32.totalorder %s17_s10, %s17_s10 }
   0xb   :  { %p950_p3 = scmp.ne.s32.totalorder %s17_s10, %s949_s20  ;;  %p955_p5 = scmp.lt.s32.totalorder %s949_s20, %s949_s20 }
   0xd   :  { %p956_p6 = por %p955_p5, %p954_p4 }
   0xf   :  { %p957_p7 = pnand %p956_p6, %p950_p3 }
  0x11   :  { %960 = shalt.err (!%p957_p7)
}
  0x12   :  { %19 = dma.hbm_to_vmem [thread:$0]  %s1651_s0, 256, %s17_s10, [#allocation3]  }
  0x13   :  { %s961_s25 = scalar_lea.hbm %s1652_s1, 256 }
  0x14   :  { %p962_p8 = scmp.ne.s32.totalorder %s1652_s1, %s961_s25  ;;  %p965_p9 = scmp.lt.u32.totalorder %s961_s25, %s1652_s1 }
  0x16   :  { %p967_p10 = pnand %p965_p9, %p962_p8 }
  0x18   :  { %970 = shalt.err (!%p967_p10)
}
  0x19   :  { %s971_s30 = scalar_lea.vmem %s27_s12, 256  ;;  %p976_p12 = scmp.lt.s32.totalorder %s27_s12, %s27_s12 }
  0x1a   :  { %p972_p11 = scmp.ne.s32.totalorder %s27_s12, %s971_s30  ;;  %p977_p13 = scmp.lt.s32.totalorder %s971_s30, %s971_s30 }
  0x1c   :  { %p978_p0 = por %p977_p13, %p976_p12 }
  0x1e   :  { %p979_p1 = pnand %p978_p0, %p972_p11 }
  0x20   :  { %982 = shalt.err (!%p979_p1)
}
  0x21   :  { %29 = dma.hbm_to_vmem [thread:$0]  %s1652_s1, 256, %s27_s12, [#allocation6]  }
  0x22   :  { %1005 = dma.done.wait [#allocation3], 256  }
  0x23   :  { %1006 = vsyncadd [#allocation3], 4294967040 }
  0x24   :  { %1007 = dma.done.wait [#allocation6], 256  }
  0x25   :  { %1008 = vsyncadd [#allocation6], 4294967040  ;;  %v60_v0 = vld [vmem:[#allocation5] sm:$0xff]  ;;  %v61_v1 = vld [vmem:[#allocation5 + $0x8] sm:$0xff]  ;;  %s1013_s1 = smov 127   ;;  %v1654_v26 = vlaneseq  ;;  %s1014_s4 = smov 126  }
  0x26   :  { %v56_v2 = vld [vmem:[#allocation2] sm:$0xff]  ;;  %v65_v3 = vmax.f32 %v60_v0, %v61_v1  ;;  %v57_v4 = vld [vmem:[#allocation2 + $0x8] sm:$0xff]  ;;  %s1015_s5 = smov 124   ;;  %s1016_s6 = smov 120  }
  0x27   :  { %v62_v5 = vmax.f32 %v56_v2, %v57_v4  ;;  %v86_v19 = vsub.f32 %v57_v4, %v61_v1  ;;  %v85_v25 = vsub.f32 %v56_v2, %v60_v0  ;;  %v1069_v27 = vand.u32 127, %v1654_v26  ;;  %s1017_s7 = smov 112   ;;  %s1018_s8 = smov 96  }
  0x28   :  { %66 = vmax.xlane.f32.xlu0 %v65_v3  ;;  %s1019_s9 = smov 64  }
  0x29   :  { %vm91_vm0 = vcmp.lt.s32.totalorder %v1069_v27, 127  ;;  %vm132_vm1 = vcmp.lt.s32.totalorder %v1069_v27, 126  ;;  %vm246_vm2 = vcmp.lt.s32.totalorder %v1069_v27, 124  ;;  %vm359_vm3 = vcmp.lt.s32.totalorder %v1069_v27, 120 }
  0x2a   :  { %vm472_vm4 = vcmp.lt.s32.totalorder %v1069_v27, 112  ;;  %vm585_vm5 = vcmp.lt.s32.totalorder %v1069_v27, 96  ;;  %vm698_vm11 = vcmp.lt.s32.totalorder %v1069_v27, 64  ;;  %vm232_vm14 = vcmp.eq.s32.totalorder %v1069_v27, 0 }
  0x2b   :  { %vm237_vm15 = vcmp.eq.s32.totalorder %v1069_v27, 1 }
  0x2c   :  { %63 = vmax.xlane.f32.xlu0 %v62_v5 }
  0xb5   :  { %v1060_v6 = vpop.xlane.xlu0 %66 }
  0xb6   :  { %v75_v7 = vsub.f32 %v60_v0, %v1060_v6  ;;  %v76_v8 = vsub.f32 %v61_v1, %v1060_v6 }
  0xb8   :  { %v77_v9 = vmul.f32 1.442695, %v75_v7  ;;  %v79_v10 = vmul.f32 1.442695, %v76_v8 }
  0xb9   :  { %v1064_v11 = vpop.xlane.xlu0 %63 }
  0xba   :  { %859 = vpow2.f32 %v77_v9  ;;  %v69_v12 = vsub.f32 %v56_v2, %v1064_v11  ;;  %v70_v13 = vsub.f32 %v57_v4, %v1064_v11 }
  0xbb   :  { %861 = vpow2.f32 %v79_v10 }
  0xbc   :  { %v71_v14 = vmul.f32 1.442695, %v69_v12  ;;  %v73_v15 = vmul.f32 1.442695, %v70_v13 }
  0xbe   :  { %863 = vpow2.f32 %v71_v14 }
  0xbf   :  { %865 = vpow2.f32 %v73_v15 }
  0xc4   :  { %v860_v16 = vpop.eup %859 }
  0xc5   :  { %104 = vrot.lane.b32.xlu1 %v860_v16, %s1013_s1  ;;  %v862_v17 = vpop.eup %861  ;;  %v83_v23 = vmul.f32 %v860_v16, %v60_v0 }
  0xc6   :  { %v84_v24 = vmul.f32 %v862_v17, %v61_v1 }
  0xc8   :  { %v864_v18 = vpop.eup %863 }
  0xc9   :  { %106 = vrot.lane.b32.xlu1 %v862_v17, %s1013_s1  ;;  %87 = vrot.lane.b32.xlu0 %v864_v18, %s1013_s1  ;;  %v866_v20 = vpop.eup %865  ;;  %v81_v21 = vmul.f32 %v864_v18, %v56_v2 }
  0xca   :  { %v82_v22 = vmul.f32 %v866_v20, %v57_v4 }
  0xcd   :  { %89 = vrot.lane.b32.xlu1 %v866_v20, %s1013_s1  ;;  %122 = vrot.lane.b32.xlu0 %v86_v19, %s1013_s1 }
  0xd1   :  { %96 = vrot.lane.b32.xlu1 %v81_v21, %s1013_s1 }
  0xd5   :  { %98 = vrot.lane.b32.xlu1 %v82_v22, %s1013_s1 }
  0xd9   :  { %112 = vrot.lane.b32.xlu1 %v83_v23, %s1013_s1 }
  0xdd   :  { %114 = vrot.lane.b32.xlu1 %v84_v24, %s1013_s1 }
  0xe1   :  { %120 = vrot.lane.b32.xlu1 %v85_v25, %s1013_s1 }
 0x137   :  { %v105_v28 = vpop.permute.xlu1 %104 }
 0x13b   :  { %v107_v29 = vpop.permute.xlu1 %106  ;;  %v88_v34 = vpop.permute.xlu0 %87 }
 0x13c   :  { %v108_v30 = vsel %vm91_vm0, %v105_v28, %v107_v29  ;;  %v109_v31 = vsel %vm91_vm0, %v107_v29, %v105_v28 }
 0x13d   :  { %v110_v32 = vadd.f32 %v860_v16, %v108_v30  ;;  %v111_v33 = vadd.f32 %v862_v17, %v109_v31 }
 0x13f   :  { %v90_v35 = vpop.permute.xlu1 %89  ;;  %147 = vrot.lane.b32.xlu0 %v111_v33, %s1014_s4  ;;  %145 = vrot.lane.b32.xlu1 %v110_v32, %s1014_s4  ;;  %v123_v52 = vpop.permute.xlu0 %122 }
 0x140   :  { %v92_v36 = vsel %vm91_vm0, %v88_v34, %v90_v35  ;;  %v93_v37 = vsel %vm91_vm0, %v90_v35, %v88_v34 }
 0x141   :  { %v94_v38 = vadd.f32 %v864_v18, %v92_v36  ;;  %v95_v39 = vadd.f32 %v866_v20, %v93_v37 }
 0x143   :  { %130 = vrot.lane.b32.xlu0 %v95_v39, %s1014_s4  ;;  %128 = vrot.lane.b32.xlu1 %v94_v38, %s1014_s4  ;;  %v97_v40 = vpop.permute.xlu1 %96 }
 0x147   :  { %v99_v41 = vpop.permute.xlu1 %98 }
 0x148   :  { %v100_v42 = vsel %vm91_vm0, %v97_v40, %v99_v41  ;;  %v101_v43 = vsel %vm91_vm0, %v99_v41, %v97_v40 }
 0x149   :  { %v102_v44 = vadd.f32 %v100_v42, %v81_v21  ;;  %v103_v45 = vadd.f32 %v101_v43, %v82_v22 }
 0x14b   :  { %139 = vrot.lane.b32.xlu0 %v103_v45, %s1014_s4  ;;  %137 = vrot.lane.b32.xlu1 %v102_v44, %s1014_s4  ;;  %v113_v46 = vpop.permute.xlu1 %112 }
 0x14f   :  { %v115_v47 = vpop.permute.xlu1 %114 }
 0x150   :  { %v116_v48 = vsel %vm91_vm0, %v113_v46, %v115_v47  ;;  %v117_v49 = vsel %vm91_vm0, %v115_v47, %v113_v46 }
 0x151   :  { %v118_v50 = vadd.f32 %v116_v48, %v83_v23  ;;  %v119_v51 = vadd.f32 %v117_v49, %v84_v24 }
 0x153   :  { %155 = vrot.lane.b32.xlu0 %v119_v51, %s1014_s4  ;;  %153 = vrot.lane.b32.xlu1 %v118_v50, %s1014_s4  ;;  %v121_v53 = vpop.permute.xlu1 %120 }
 0x154   :  { %v124_v54 = vsel %vm91_vm0, %v121_v53, %v123_v52  ;;  %v125_v55 = vsel %vm91_vm0, %v123_v52, %v121_v53 }
 0x155   :  { %v126_v56 = vadd.f32 %v124_v54, %v85_v25  ;;  %v127_v57 = vadd.f32 %v125_v55, %v86_v19 }
 0x157   :  { %163 = vrot.lane.b32.xlu0 %v127_v57, %s1014_s4  ;;  %161 = vrot.lane.b32.xlu1 %v126_v56, %s1014_s4  ;;  %s1020_s4 = smov [#allocation7]  }
 0x1b1   :  { %v148_v58 = vpop.permute.xlu0 %147  ;;  %v146_v59 = vpop.permute.xlu1 %145 }
 0x1b2   :  { %v149_v60 = vsel %vm132_vm1, %v146_v59, %v148_v58  ;;  %v150_v61 = vsel %vm132_vm1, %v148_v58, %v146_v59 }
 0x1b3   :  { %v1107_v62 = vadd.f32 %v149_v60, %v110_v32  ;;  %v1109_v63 = vadd.f32 %v150_v61, %v111_v33 }
 0x1b5   :  { %v131_v0 = vpop.permute.xlu0 %130  ;;  %261 = vrot.lane.b32.xlu0 %v1109_v63, %s1015_s5  ;;  %259 = vrot.lane.b32.xlu1 %v1107_v62, %s1015_s5  ;;  %v129_v1 = vpop.permute.xlu1 %128 }
 0x1b6   :  { %v133_v2 = vsel %vm132_vm1, %v129_v1, %v131_v0  ;;  %v134_v3 = vsel %vm132_vm1, %v131_v0, %v129_v1 }
 0x1b7   :  { %v1119_v4 = vadd.f32 %v133_v2, %v94_v38  ;;  %v1121_v5 = vadd.f32 %v134_v3, %v95_v39 }
 0x1b9   :  { %244 = vrot.lane.b32.xlu0 %v1121_v5, %s1015_s5  ;;  %242 = vrot.lane.b32.xlu1 %v1119_v4, %s1015_s5 }
 0x1bd   :  { %v140_v7 = vpop.permute.xlu0 %139  ;;  %v138_v8 = vpop.permute.xlu1 %137 }
 0x1be   :  { %v141_v9 = vsel %vm132_vm1, %v138_v8, %v140_v7  ;;  %v142_v10 = vsel %vm132_vm1, %v140_v7, %v138_v8 }
 0x1bf   :  { %v1131_v12 = vadd.f32 %v141_v9, %v102_v44  ;;  %v1133_v13 = vadd.f32 %v142_v10, %v103_v45 }
 0x1c1   :  { %253 = vrot.lane.b32.xlu0 %v1133_v13, %s1015_s5  ;;  %251 = vrot.lane.b32.xlu1 %v1131_v12, %s1015_s5 }
 0x1c5   :  { %v156_v14 = vpop.permute.xlu0 %155  ;;  %v154_v15 = vpop.permute.xlu1 %153 }
 0x1c6   :  { %v157_v16 = vsel %vm132_vm1, %v154_v15, %v156_v14  ;;  %v158_v17 = vsel %vm132_vm1, %v156_v14, %v154_v15 }
 0x1c7   :  { %v1143_v18 = vadd.f32 %v157_v16, %v118_v50  ;;  %v1145_v19 = vadd.f32 %v158_v17, %v119_v51 }
 0x1c9   :  { %v164_v20 = vpop.permute.xlu0 %163  ;;  %269 = vrot.lane.b32.xlu0 %v1145_v19, %s1015_s5  ;;  %267 = vrot.lane.b32.xlu1 %v1143_v18, %s1015_s5  ;;  %v162_v21 = vpop.permute.xlu1 %161 }
 0x1ca   :  { %v165_v22 = vsel %vm132_vm1, %v162_v21, %v164_v20  ;;  %v166_v23 = vsel %vm132_vm1, %v164_v20, %v162_v21 }
 0x1cb   :  { %v1155_v24 = vadd.f32 %v165_v22, %v126_v56  ;;  %v1157_v25 = vadd.f32 %v166_v23, %v127_v57 }
 0x1cd   :  { %277 = vrot.lane.b32.xlu0 %v1157_v25, %s1015_s5  ;;  %275 = vrot.lane.b32.xlu1 %v1155_v24, %s1015_s5  ;;  %s815_s5 = sshll.u32 %s1020_s4, 4  ;;  %s816_s5 = int_to_ptr.vmem [resolvable:$true] %s815_s5 }
 0x1ce   :  { %p988_p3 = scmp.lt.s32.totalorder %s816_s5, %s816_s5 }
 0x227   :  { %v262_v28 = vpop.permute.xlu0 %261  ;;  %v260_v29 = vpop.permute.xlu1 %259 }
 0x228   :  { %v263_v30 = vsel %vm246_vm2, %v260_v29, %v262_v28  ;;  %v264_v31 = vsel %vm246_vm2, %v262_v28, %v260_v29 }
 0x229   :  { %v1169_v32 = vadd.f32 %v263_v30, %v1107_v62  ;;  %v1172_v33 = vadd.f32 %v264_v31, %v1109_v63 }
 0x22b   :  { %v245_v34 = vpop.permute.xlu0 %244  ;;  %374 = vrot.lane.b32.xlu0 %v1172_v33, %s1016_s6  ;;  %372 = vrot.lane.b32.xlu1 %v1169_v32, %s1016_s6  ;;  %v243_v35 = vpop.permute.xlu1 %242 }
 0x22c   :  { %v247_v36 = vsel %vm246_vm2, %v243_v35, %v245_v34  ;;  %v248_v37 = vsel %vm246_vm2, %v245_v34, %v243_v35 }
 0x22d   :  { %v1183_v38 = vadd.f32 %v247_v36, %v1119_v4  ;;  %v1186_v39 = vadd.f32 %v248_v37, %v1121_v5 }
 0x22f   :  { %357 = vrot.lane.b32.xlu0 %v1186_v39, %s1016_s6  ;;  %355 = vrot.lane.b32.xlu1 %v1183_v38, %s1016_s6 }
 0x233   :  { %v254_v40 = vpop.permute.xlu0 %253  ;;  %v252_v41 = vpop.permute.xlu1 %251 }
 0x234   :  { %v255_v42 = vsel %vm246_vm2, %v252_v41, %v254_v40  ;;  %v256_v43 = vsel %vm246_vm2, %v254_v40, %v252_v41 }
 0x235   :  { %v1197_v44 = vadd.f32 %v255_v42, %v1131_v12  ;;  %v1200_v45 = vadd.f32 %v256_v43, %v1133_v13 }
 0x237   :  { %366 = vrot.lane.b32.xlu0 %v1200_v45, %s1016_s6  ;;  %364 = vrot.lane.b32.xlu1 %v1197_v44, %s1016_s6 }
 0x23b   :  { %v270_v46 = vpop.permute.xlu0 %269  ;;  %v268_v47 = vpop.permute.xlu1 %267 }
 0x23c   :  { %v271_v48 = vsel %vm246_vm2, %v268_v47, %v270_v46  ;;  %v272_v49 = vsel %vm246_vm2, %v270_v46, %v268_v47 }
 0x23d   :  { %v1211_v50 = vadd.f32 %v271_v48, %v1143_v18  ;;  %v1214_v51 = vadd.f32 %v272_v49, %v1145_v19 }
 0x23f   :  { %v278_v52 = vpop.permute.xlu0 %277  ;;  %382 = vrot.lane.b32.xlu0 %v1214_v51, %s1016_s6  ;;  %380 = vrot.lane.b32.xlu1 %v1211_v50, %s1016_s6  ;;  %v276_v53 = vpop.permute.xlu1 %275 }
 0x240   :  { %v279_v54 = vsel %vm246_vm2, %v276_v53, %v278_v52  ;;  %v280_v55 = vsel %vm246_vm2, %v278_v52, %v276_v53  ;;  %vm345_vm2 = vcmp.eq.s32.totalorder %v1069_v27, 2 }
 0x241   :  { %v1225_v56 = vadd.f32 %v279_v54, %v1155_v24  ;;  %v1228_v57 = vadd.f32 %v280_v55, %v1157_v25 }
 0x243   :  { %390 = vrot.lane.b32.xlu0 %v1228_v57, %s1016_s6  ;;  %388 = vrot.lane.b32.xlu1 %v1225_v56, %s1016_s6  ;;  %s983_s6 = scalar_lea.vmem %s816_s5, 128 }
 0x244   :  { %p984_p2 = scmp.ne.s32.totalorder %s816_s5, %s983_s6  ;;  %p989_p4 = scmp.lt.s32.totalorder %s983_s6, %s983_s6 }
 0x246   :  { %p990_p5 = por %p989_p4, %p988_p3 }
 0x248   :  { %p991_p6 = pnand %p990_p5, %p984_p2 }
 0x29d   :  { %v375_v58 = vpop.permute.xlu0 %374  ;;  %v373_v59 = vpop.permute.xlu1 %372 }
 0x29e   :  { %v376_v60 = vsel %vm359_vm3, %v373_v59, %v375_v58  ;;  %v377_v61 = vsel %vm359_vm3, %v375_v58, %v373_v59 }
 0x29f   :  { %v1240_v0 = vadd.f32 %v376_v60, %v1169_v32  ;;  %v1243_v1 = vadd.f32 %v377_v61, %v1172_v33 }
 0x2a1   :  { %v358_v2 = vpop.permute.xlu0 %357  ;;  %487 = vrot.lane.b32.xlu0 %v1243_v1, %s1017_s7  ;;  %485 = vrot.lane.b32.xlu1 %v1240_v0, %s1017_s7  ;;  %v356_v3 = vpop.permute.xlu1 %355 }
 0x2a2   :  { %v360_v7 = vsel %vm359_vm3, %v356_v3, %v358_v2  ;;  %v361_v8 = vsel %vm359_vm3, %v358_v2, %v356_v3 }
 0x2a3   :  { %v1254_v9 = vadd.f32 %v360_v7, %v1183_v38  ;;  %v1257_v10 = vadd.f32 %v361_v8, %v1186_v39 }
 0x2a5   :  { %470 = vrot.lane.b32.xlu0 %v1257_v10, %s1017_s7  ;;  %468 = vrot.lane.b32.xlu1 %v1254_v9, %s1017_s7 }
 0x2a9   :  { %v367_v14 = vpop.permute.xlu0 %366  ;;  %v365_v15 = vpop.permute.xlu1 %364 }
 0x2aa   :  { %v368_v16 = vsel %vm359_vm3, %v365_v15, %v367_v14  ;;  %v369_v17 = vsel %vm359_vm3, %v367_v14, %v365_v15 }
 0x2ab   :  { %v1268_v20 = vadd.f32 %v368_v16, %v1197_v44  ;;  %v1271_v21 = vadd.f32 %v369_v17, %v1200_v45 }
 0x2ad   :  { %479 = vrot.lane.b32.xlu0 %v1271_v21, %s1017_s7  ;;  %477 = vrot.lane.b32.xlu1 %v1268_v20, %s1017_s7 }
 0x2b1   :  { %v383_v22 = vpop.permute.xlu0 %382  ;;  %v381_v23 = vpop.permute.xlu1 %380 }
 0x2b2   :  { %v384_v28 = vsel %vm359_vm3, %v381_v23, %v383_v22  ;;  %v385_v29 = vsel %vm359_vm3, %v383_v22, %v381_v23 }
 0x2b3   :  { %v1282_v30 = vadd.f32 %v384_v28, %v1211_v50  ;;  %v1285_v31 = vadd.f32 %v385_v29, %v1214_v51 }
 0x2b5   :  { %v391_v34 = vpop.permute.xlu0 %390  ;;  %495 = vrot.lane.b32.xlu0 %v1285_v31, %s1017_s7  ;;  %493 = vrot.lane.b32.xlu1 %v1282_v30, %s1017_s7  ;;  %v389_v35 = vpop.permute.xlu1 %388 }
 0x2b6   :  { %v392_v36 = vsel %vm359_vm3, %v389_v35, %v391_v34  ;;  %v393_v37 = vsel %vm359_vm3, %v391_v34, %v389_v35  ;;  %vm350_vm3 = vcmp.eq.s32.totalorder %v1069_v27, 3 }
 0x2b7   :  { %v1296_v40 = vadd.f32 %v392_v36, %v1225_v56  ;;  %v1299_v41 = vadd.f32 %v393_v37, %v1228_v57 }
 0x2b9   :  { %503 = vrot.lane.b32.xlu0 %v1299_v41, %s1017_s7  ;;  %501 = vrot.lane.b32.xlu1 %v1296_v40, %s1017_s7 }
 0x313   :  { %v488_v42 = vpop.permute.xlu0 %487  ;;  %v486_v43 = vpop.permute.xlu1 %485 }
 0x314   :  { %v489_v46 = vsel %vm472_vm4, %v486_v43, %v488_v42  ;;  %v490_v47 = vsel %vm472_vm4, %v488_v42, %v486_v43 }
 0x315   :  { %v1311_v48 = vadd.f32 %v489_v46, %v1240_v0  ;;  %v1314_v49 = vadd.f32 %v490_v47, %v1243_v1 }
 0x317   :  { %v471_v52 = vpop.permute.xlu0 %470  ;;  %600 = vrot.lane.b32.xlu0 %v1314_v49, %s1018_s8  ;;  %598 = vrot.lane.b32.xlu1 %v1311_v48, %s1018_s8  ;;  %v469_v53 = vpop.permute.xlu1 %468 }
 0x318   :  { %v473_v54 = vsel %vm472_vm4, %v469_v53, %v471_v52  ;;  %v474_v55 = vsel %vm472_vm4, %v471_v52, %v469_v53 }
 0x319   :  { %v1325_v58 = vadd.f32 %v473_v54, %v1254_v9  ;;  %v1328_v59 = vadd.f32 %v474_v55, %v1257_v10  ;;  %v171_v54 = vmax.f32 %v1107_v62, 1e-30 }
 0x31b   :  { %583 = vrot.lane.b32.xlu0 %v1328_v59, %s1018_s8  ;;  %581 = vrot.lane.b32.xlu1 %v1325_v58, %s1018_s8  ;;  %867 = vrcp.f32 %v171_v54  ;;  %v170_v54 = vmax.f32 %v1121_v5, 1e-30 }
 0x31f   :  { %v480_v60 = vpop.permute.xlu0 %479  ;;  %v478_v61 = vpop.permute.xlu1 %477 }
 0x320   :  { %v481_v2 = vsel %vm472_vm4, %v478_v61, %v480_v60  ;;  %v482_v3 = vsel %vm472_vm4, %v480_v60, %v478_v61 }
 0x321   :  { %v1339_v7 = vadd.f32 %v481_v2, %v1268_v20  ;;  %v1342_v8 = vadd.f32 %v482_v3, %v1271_v21  ;;  %v172_v3 = vmax.f32 %v1109_v63, 1e-30  ;;  %v285_v63 = vmax.f32 %v1169_v32, 1e-30 }
 0x322   :  { %v398_v32 = vmax.f32 %v1240_v0, 1e-30 }
 0x323   :  { %592 = vrot.lane.b32.xlu0 %v1342_v8, %s1018_s8  ;;  %590 = vrot.lane.b32.xlu1 %v1339_v7, %s1018_s8  ;;  %869 = vrcp.f32 %v172_v3 }
 0x327   :  { %v496_v14 = vpop.permute.xlu0 %495  ;;  %v494_v15 = vpop.permute.xlu1 %493 }
 0x328   :  { %v497_v16 = vsel %vm472_vm4, %v494_v15, %v496_v14  ;;  %v498_v17 = vsel %vm472_vm4, %v496_v14, %v494_v15  ;;  %v286_v15 = vmax.f32 %v1172_v33, 1e-30  ;;  %v1425_v33 = vpop.eup %867 }
 0x329   :  { %v1353_v22 = vadd.f32 %v497_v16, %v1282_v30  ;;  %v1356_v23 = vadd.f32 %v498_v17, %v1285_v31 }
 0x32a   :  { %871 = vrcp.f32 %v286_v15 }
 0x32b   :  { %v504_v28 = vpop.permute.xlu0 %503  ;;  %608 = vrot.lane.b32.xlu0 %v1356_v23, %s1018_s8  ;;  %606 = vrot.lane.b32.xlu1 %v1353_v22, %s1018_s8  ;;  %v502_v29 = vpop.permute.xlu1 %501  ;;  %873 = vrcp.f32 %v285_v63 }
 0x32c   :  { %v505_v34 = vsel %vm472_vm4, %v502_v29, %v504_v28  ;;  %v506_v35 = vsel %vm472_vm4, %v504_v28, %v502_v29 }
 0x32d   :  { %v1367_v36 = vadd.f32 %v505_v34, %v1296_v40  ;;  %v1370_v37 = vadd.f32 %v506_v35, %v1299_v41 }
 0x32f   :  { %616 = vrot.lane.b32.xlu0 %v1370_v37, %s1018_s8  ;;  %614 = vrot.lane.b32.xlu1 %v1367_v36, %s1018_s8 }
 0x389   :  { %v601_v42 = vpop.permute.xlu0 %600  ;;  %v599_v43 = vpop.permute.xlu1 %598 }
 0x38a   :  { %v602_v46 = vsel %vm585_vm5, %v599_v43, %v601_v42  ;;  %v603_v47 = vsel %vm585_vm5, %v601_v42, %v599_v43  ;;  %v399_v42 = vmax.f32 %v1243_v1, 1e-30  ;;  %v169_v43 = vmax.f32 %v1119_v4, 1e-30 }
 0x38b   :  { %v1382_v52 = vadd.f32 %v602_v46, %v1311_v48  ;;  %v1385_v53 = vadd.f32 %v603_v47, %v1314_v49  ;;  %v512_v46 = vmax.f32 %v1314_v49, 1e-30  ;;  %v870_v47 = vpop.eup %869  ;;  %v511_v4 = vmax.f32 %v1311_v48, 1e-30 }
 0x38c   :  { %875 = vrcp.f32 %v399_v42  ;;  %v189_v0 = vmul.f32 %v1425_v33, %v169_v43  ;;  %v190_v5 = vmul.f32 %v870_v47, %v170_v54  ;;  %v872_v48 = vpop.eup %871 }
 0x38d   :  { %v584_v55 = vpop.permute.xlu0 %583  ;;  %713 = vrot.lane.b32.xlu0 %v1385_v53, %s1019_s9  ;;  %711 = vrot.lane.b32.xlu1 %v1382_v52, %s1019_s9  ;;  %v582_v60 = vpop.permute.xlu1 %581  ;;  %877 = vrcp.f32 %v398_v32  ;;  %v625_v3 = vmax.f32 %v1385_v53, 1e-30 }
 0x38e   :  { %v586_v61 = vsel %vm585_vm5, %v582_v60, %v584_v55  ;;  %v587_v2 = vsel %vm585_vm5, %v584_v55, %v582_v60  ;;  %879 = vrcp.f32 %v169_v43  ;;  %v874_v43 = vpop.eup %873 }
 0x38f   :  { %v1398_v14 = vadd.f32 %v586_v61, %v1325_v58  ;;  %v1401_v62 = vadd.f32 %v587_v2, %v1328_v59  ;;  %881 = vrcp.f32 %v512_v46  ;;  %v624_v46 = vmax.f32 %v1382_v52, 1e-30 }
 0x390   :  { %883 = vrcp.f32 %v170_v54  ;;  %v397_v54 = vmax.f32 %v1257_v10, 1e-30  ;;  %v509_v10 = vmax.f32 %v1325_v58, 1e-30 }
 0x391   :  { %696 = vrot.lane.b32.xlu0 %v1401_v62, %s1019_s9  ;;  %694 = vrot.lane.b32.xlu1 %v1398_v14, %s1019_s9  ;;  %885 = vlog2.f32 %v189_v0 }
 0x392   :  { %887 = vrcp.f32 %v511_v4 }
 0x393   :  { %889 = vlog2.f32 %v190_v5  ;;  %v510_v5 = vmax.f32 %v1328_v59, 1e-30 }
 0x394   :  { %891 = vrcp.f32 %v625_v3 }
 0x395   :  { %v593_v16 = vpop.permute.xlu0 %592  ;;  %v591_v17 = vpop.permute.xlu1 %590 }
 0x396   :  { %v594_v28 = vsel %vm585_vm5, %v591_v17, %v593_v16  ;;  %v595_v29 = vsel %vm585_vm5, %v593_v16, %v591_v17  ;;  %v284_v17 = vmax.f32 %v1186_v39, 1e-30 }
 0x397   :  { %v1414_v34 = vadd.f32 %v594_v28, %v1339_v7  ;;  %v1417_v35 = vadd.f32 %v595_v29, %v1342_v8  ;;  %v283_v29 = vmax.f32 %v1183_v38, 1e-30  ;;  %v876_v38 = vpop.eup %875 }
 0x398   :  { %v304_v39 = vmul.f32 %v872_v48, %v284_v17  ;;  %893 = vrcp.f32 %v284_v17  ;;  %v417_v0 = vmul.f32 %v876_v38, %v397_v54 }
 0x399   :  { %705 = vrot.lane.b32.xlu0 %v1417_v35, %s1019_s9  ;;  %703 = vrot.lane.b32.xlu1 %v1414_v34, %s1019_s9  ;;  %895 = vrcp.f32 %v283_v29 }
 0x39a   :  { %897 = vrcp.f32 %v624_v46 }
 0x39b   :  { %899 = vlog2.f32 %v304_v39 }
 0x39c   :  { %901 = vrcp.f32 %v397_v54 }
 0x39d   :  { %v609_v1 = vpop.permute.xlu0 %608  ;;  %v607_v55 = vpop.permute.xlu1 %606 }
 0x39e   :  { %v610_v60 = vsel %vm585_vm5, %v607_v55, %v609_v1  ;;  %v611_v61 = vsel %vm585_vm5, %v609_v1, %v607_v55  ;;  %v303_v1 = vmul.f32 %v874_v43, %v283_v29  ;;  %v878_v55 = vpop.eup %877  ;;  %v623_v29 = vmax.f32 %v1401_v62, 1e-30 }
 0x39f   :  { %v1437_v2 = vadd.f32 %v610_v60, %v1353_v22  ;;  %v1440_v49 = vadd.f32 %v611_v61, %v1356_v23  ;;  %v396_v60 = vmax.f32 %v1254_v9, 1e-30  ;;  %v880_v61 = vpop.eup %879 }
 0x3a0   :  { %v882_v4 = vpop.eup %881  ;;  %903 = vlog2.f32 %v303_v1  ;;  %v298_v1 = vmul.f32 %v872_v48, %v1214_v51  ;;  %v1489_v51 = vadd.s32 128, %v1069_v27 }
 0x3a1   :  { %v617_v15 = vpop.permute.xlu0 %616  ;;  %721 = vrot.lane.b32.xlu0 %v1440_v49, %s1019_s9  ;;  %719 = vrot.lane.b32.xlu1 %v1437_v2, %s1019_s9  ;;  %v615_v16 = vpop.permute.xlu1 %614  ;;  %905 = vrcp.f32 %v396_v60 }
 0x3a2   :  { %v618_v63 = vsel %vm585_vm5, %v615_v16, %v617_v15  ;;  %v619_v28 = vsel %vm585_vm5, %v617_v15, %v615_v16  ;;  %v884_v3 = vpop.eup %883  ;;  %v416_v15 = vmul.f32 %v878_v55, %v396_v60  ;;  %907 = vlog2.f32 %v417_v0 }
 0x3a3   :  { %v1454_v42 = vadd.f32 %v618_v63, %v1367_v36  ;;  %v1457_v32 = vadd.f32 %v619_v28, %v1370_v37  ;;  %v886_v16 = vpop.eup %885  ;;  %v530_v63 = vmul.f32 %v882_v4, %v510_v5  ;;  %v184_v28 = vmul.f32 %v870_v47, %v1145_v19 }
 0x3a4   :  { %v1468_v17 = vpop.eup %887  ;;  %909 = vrcp.f32 %v510_v5  ;;  %v182_v39 = vmul.f32 %v884_v3, %v1133_v13  ;;  %v622_v60 = vmax.f32 %v1398_v14, 1e-30  ;;  %v183_v19 = vmul.f32 %v1425_v33, %v1143_v18 }
 0x3a5   :  { %729 = vrot.lane.b32.xlu0 %v1457_v32, %s1019_s9  ;;  %727 = vrot.lane.b32.xlu1 %v1454_v42, %s1019_s9  ;;  %v890_v9 = vpop.eup %889  ;;  %911 = vlog2.f32 %v416_v15  ;;  %v529_v54 = vmul.f32 %v1468_v17, %v509_v10  ;;  %v1485_v13 = vsub.f32 %v1064_v11, %v1060_v6  ;;  %vm42_vm6 = vcmp.lt.s32.totalorder %v1489_v51, 253 }
 0x3a6   :  { %v1472_v46 = vpop.eup %891  ;;  %913 = vrcp.f32 %v509_v10  ;;  %v186_v5 = vsub.f32 %v182_v39, %v184_v28  ;;  %v181_v10 = vmul.f32 %v880_v61, %v1131_v12  ;;  %v194_v18 = vmul.f32 0.6931472, %v890_v9 }
 0x3a7   :  { %v894_v59 = vpop.eup %893  ;;  %915 = vlog2.f32 %v530_v63  ;;  %v643_v47 = vmul.f32 %v1472_v46, %v623_v29  ;;  %v297_v63 = vmul.f32 %v874_v43, %v1211_v50  ;;  %v411_v28 = vmul.f32 %v876_v38, %v1285_v31 }
 0x3a8   :  { %v896_v58 = vpop.eup %895  ;;  %917 = vrcp.f32 %v623_v29  ;;  %v296_v3 = vmul.f32 %v894_v59, %v1200_v45  ;;  %v185_v59 = vsub.f32 %v181_v10, %v183_v19  ;;  %v188_v39 = vsub.f32 %v186_v5, %v1485_v13 }
 0x3a9   :  { %v1478_v0 = vpop.eup %897  ;;  %919 = vlog2.f32 %v529_v54  ;;  %v295_v45 = vmul.f32 %v896_v58, %v1197_v44  ;;  %v215_v50 = vmul.f32 %v1157_v25, %v1157_v25  ;;  %v410_v38 = vmul.f32 %v878_v55, %v1282_v30 }
 0x3aa   :  { %v900_v15 = vpop.eup %899  ;;  %921 = vrcp.f32 %v622_v60  ;;  %v300_v29 = vsub.f32 %v296_v3, %v298_v1  ;;  %v642_v6 = vmul.f32 %v1478_v0, %v622_v60  ;;  %v192_v9 = vmul.f32 0.6931472, %v886_v16 }
 0x3ab   :  { %v902_v48 = vpop.eup %901  ;;  %923 = vlog2.f32 %v643_v47  ;;  %v308_v31 = vmul.f32 0.6931472, %v900_v15  ;;  %v299_v61 = vsub.f32 %v295_v45, %v297_v63  ;;  %v196_v54 = vsub.f32 %v188_v39, %v194_v18 }
 0x3ac   :  { %v904_v33 = vpop.eup %903  ;;  %v409_v12 = vmul.f32 %v902_v48, %v1271_v21  ;;  %v524_v58 = vmul.f32 %v882_v4, %v1356_v23  ;;  %v302_v1 = vsub.f32 %v300_v29, %v1485_v13  ;;  %925 = vlog2.f32 %v642_v6 }
 0x3ad   :  { %v906_v11 = vpop.eup %905  ;;  %v214_v25 = vmul.f32 %v1155_v24, %v1155_v24  ;;  %v306_v47 = vmul.f32 0.6931472, %v904_v33  ;;  %v187_v5 = vsub.f32 %v185_v59, %v1485_v13  ;;  %v217_v16 = vsel %vm42_vm6, %v215_v50, 0.0 }
 0x3ae   :  { %v908_v26 = vpop.eup %907  ;;  %v413_v60 = vsub.f32 %v409_v12, %v411_v28  ;;  %v408_v19 = vmul.f32 %v906_v11, %v1268_v20  ;;  %v310_v23 = vsub.f32 %v302_v1, %v308_v31  ;;  %v523_v3 = vmul.f32 %v1468_v17, %v1353_v22 }
 0x3af   :  { %v910_v43 = vpop.eup %909  ;;  %v421_v4 = vmul.f32 0.6931472, %v908_v26  ;;  %v301_v20 = vsub.f32 %v299_v61, %v1485_v13  ;;  %v195_v48 = vsub.f32 %v187_v5, %v192_v9  ;;  %v637_v24 = vmul.f32 %v1472_v46, %v1440_v49 }
 0x3b0   :  { %v912_v44 = vpop.eup %911  ;;  %v522_v55 = vmul.f32 %v910_v43, %v1342_v8  ;;  %v412_v10 = vsub.f32 %v408_v19, %v410_v38  ;;  %v198_v63 = vand.u32 2147483647, %v196_v54  ;;  %v415_v18 = vsub.f32 %v413_v60, %v1485_v13 }
 0x3b1   :  { %v914_v21 = vpop.eup %913  ;;  %vm44_vm7 = vcmp.lt.s32.totalorder %v1489_v51, 249  ;;  %v309_v26 = vsub.f32 %v301_v20, %v306_v47  ;;  %v419_v29 = vmul.f32 0.6931472, %v912_v44  ;;  %v312_v17 = vand.u32 2147483647, %v310_v23 }
 0x3b2   :  { %v916_v30 = vpop.eup %915  ;;  %v526_v8 = vsub.f32 %v522_v55, %v524_v58  ;;  %v521_v28 = vmul.f32 %v914_v21, %v1339_v7  ;;  %v423_v11 = vsub.f32 %v415_v18, %v421_v4  ;;  %v636_v46 = vmul.f32 %v1478_v0, %v1437_v2 }
 0x3b3   :  { %v918_v15 = vpop.eup %917  ;;  %v534_v45 = vmul.f32 0.6931472, %v916_v30  ;;  %v218_v39 = vadd.f32 %v217_v16, %v214_v25  ;;  %v414_v12 = vsub.f32 %v412_v10, %v1485_v13  ;;  %v197_v31 = vand.u32 2147483647, %v195_v48 }
 0x3b4   :  { %v920_v33 = vpop.eup %919  ;;  %v635_v22 = vmul.f32 %v918_v15, %v1417_v35  ;;  %v525_v50 = vsub.f32 %v521_v28, %v523_v3  ;;  %v200_v7 = vsel %vm42_vm6, %v198_v63, 0.0  ;;  %v528_v43 = vsub.f32 %v526_v8, %v1485_v13 }
 0x3b5   :  { %v922_v6 = vpop.eup %921  ;;  %v311_v9 = vand.u32 2147483647, %v309_v26  ;;  %v422_v54 = vsub.f32 %v414_v12, %v419_v29  ;;  %v532_v44 = vmul.f32 0.6931472, %v920_v33  ;;  %v314_v0 = vsel %vm44_vm7, %v312_v17, 0.0 }
 0x3b6   :  { %v924_v59 = vpop.eup %923  ;;  %v639_v38 = vsub.f32 %v635_v22, %v637_v24  ;;  %v634_v61 = vmul.f32 %v922_v6, %v1414_v34  ;;  %v425_v1 = vand.u32 2147483647, %v423_v11  ;;  %v536_v60 = vsub.f32 %v528_v43, %v534_v45 }
 0x3b7   :  { %v926_v58 = vpop.eup %925  ;;  %v647_v21 = vmul.f32 0.6931472, %v924_v59  ;;  %v329_v19 = vmul.f32 %v1228_v57, %v1228_v57  ;;  %v527_v25 = vsub.f32 %v525_v50, %v1485_v13  ;;  %v201_v5 = vadd.f32 %v200_v7, %v197_v31 }
 0x3b8   :  { %v638_v47 = vsub.f32 %v634_v61, %v636_v46  ;;  %vm46_vm8 = vcmp.lt.s32.totalorder %v1489_v51, 241  ;;  %v641_v30 = vsub.f32 %v639_v38, %v1485_v13  ;;  %v315_v55 = vadd.f32 %v314_v0, %v311_v9 }
 0x3b9   :  { %v424_v16 = vand.u32 2147483647, %v422_v54  ;;  %v535_v23 = vsub.f32 %v527_v25, %v532_v44  ;;  %v645_v4 = vmul.f32 0.6931472, %v926_v58  ;;  %v427_v15 = vsel %vm46_vm8, %v425_v1, 0.0 }
 0x3ba   :  { %v328_v3 = vmul.f32 %v1225_v56, %v1225_v56  ;;  %v538_v20 = vand.u32 2147483647, %v536_v60  ;;  %v649_v57 = vsub.f32 %v641_v30, %v647_v21  ;;  %v331_v48 = vsel %vm44_vm7, %v329_v19, 0.0 }
 0x3bb   :  { %v442_v10 = vmul.f32 %v1299_v41, %v1299_v41  ;;  %v640_v24 = vsub.f32 %v638_v47, %v1485_v13  ;;  %v428_v63 = vadd.f32 %v427_v15, %v424_v16  ;;  %vm48_vm9 = vcmp.lt.s32.totalorder %v1489_v51, 225 }
 0x3bc   :  { %v537_v18 = vand.u32 2147483647, %v535_v23  ;;  %v332_v33 = vadd.f32 %v331_v48, %v328_v3  ;;  %v540_v56 = vsel %vm48_vm9, %v538_v20, 0.0  ;;  %v441_v28 = vmul.f32 %v1296_v40, %v1296_v40 }
 0x3bd   :  { %v648_v8 = vsub.f32 %v640_v24, %v645_v4  ;;  %v651_v26 = vand.u32 2147483647, %v649_v57  ;;  %v444_v41 = vsel %vm46_vm8, %v442_v10, 0.0  ;;  %v555_v29 = vmul.f32 %v1370_v37, %v1370_v37 }
 0x3be   :  { %v541_v6 = vadd.f32 %v540_v56, %v537_v18  ;;  %vm50_vm10 = vcmp.lt.s32.totalorder %v1489_v51, 193  ;;  %v445_v17 = vadd.f32 %v444_v41, %v441_v28  ;;  %v554_v45 = vmul.f32 %v1367_v36, %v1367_v36 }
 0x3bf   :  { %v650_v22 = vand.u32 2147483647, %v648_v8  ;;  %v653_v11 = vsel %vm50_vm10, %v651_v26, 0.0  ;;  %v557_v40 = vsel %vm48_vm9, %v555_v29, 0.0  ;;  %v668_v59 = vmul.f32 %v1457_v32, %v1457_v32 }
 0x3c0   :  { %v558_v37 = vadd.f32 %v557_v40, %v554_v45  ;;  %vm52_vm12 = vcmp.lt.s32.totalorder %v1489_v51, 129  ;;  %vm458_vm6 = vcmp.eq.s32.totalorder %v1069_v27, 4  ;;  %vm463_vm7 = vcmp.eq.s32.totalorder %v1069_v27, 5 }
 0x3c1   :  { %v654_v46 = vadd.f32 %v653_v11, %v650_v22  ;;  %v670_v12 = vsel %vm50_vm10, %v668_v59, 0.0  ;;  %vm571_vm10 = vcmp.eq.s32.totalorder %v1069_v27, 6 }
 0x3c4   :  { %219 = vadd.xlane.f32.xlu0 %v218_v39  ;;  %v667_v39 = vmul.f32 %v1454_v42, %v1454_v42 }
 0x3c6   :  { %v671_v50 = vadd.f32 %v670_v12, %v667_v39 }
 0x3c8   :  { %316 = vadd.xlane.f32.xlu0 %v315_v55 }
 0x3c9   :  { %202 = vadd.xlane.f32.xlu1 %v201_v5 }
 0x3cc   :  { %429 = vadd.xlane.f32.xlu0 %v428_v63 }
 0x3cd   :  { %333 = vadd.xlane.f32.xlu1 %v332_v33 }
 0x3d0   :  { %542 = vadd.xlane.f32.xlu0 %v541_v6 }
 0x3d1   :  { %446 = vadd.xlane.f32.xlu1 %v445_v17 }
 0x3d4   :  { %655 = vadd.xlane.f32.xlu0 %v654_v46 }
 0x3d5   :  { %559 = vadd.xlane.f32.xlu1 %v558_v37 }
 0x3d9   :  { %672 = vadd.xlane.f32.xlu1 %v671_v50 }
 0x3ff   :  { %v714_v36 = vpop.permute.xlu0 %713  ;;  %v712_v31 = vpop.permute.xlu1 %711 }
 0x400   :  { %v715_v7 = vsel %vm698_vm11, %v712_v31, %v714_v36  ;;  %v716_v43 = vsel %vm698_vm11, %v714_v36, %v712_v31 }
 0x401   :  { %v717_v38 = vadd.f32 %v715_v7, %v1382_v52  ;;  %v718_v61 = vadd.f32 %v716_v43, %v1385_v53 }
 0x403   :  { %v737_v9 = vmax.f32 %v717_v38, 1e-30  ;;  %v738_v54 = vmax.f32 %v718_v61, 1e-30  ;;  %v697_v44 = vpop.permute.xlu0 %696  ;;  %v695_v58 = vpop.permute.xlu1 %694 }
 0x404   :  { %v699_v0 = vsel %vm698_vm11, %v695_v58, %v697_v44  ;;  %v700_v1 = vsel %vm698_vm11, %v697_v44, %v695_v58 }
 0x405   :  { %927 = vrcp.f32 %v737_v9  ;;  %v701_v60 = vadd.f32 %v699_v0, %v1398_v14  ;;  %v702_v21 = vadd.f32 %v700_v1, %v1401_v62 }
 0x406   :  { %929 = vrcp.f32 %v738_v54 }
 0x407   :  { %v735_v19 = vmax.f32 %v701_v60, 1e-30  ;;  %v736_v52 = vmax.f32 %v702_v21, 1e-30 }
 0x409   :  { %931 = vrcp.f32 %v735_v19 }
 0x40a   :  { %933 = vrcp.f32 %v736_v52 }
 0x40b   :  { %v706_v25 = vpop.permute.xlu0 %705  ;;  %v704_v47 = vpop.permute.xlu1 %703 }
 0x40c   :  { %v707_v16 = vsel %vm698_vm11, %v704_v47, %v706_v25  ;;  %v708_v14 = vsel %vm698_vm11, %v706_v25, %v704_v47 }
 0x40d   :  { %v709_v57 = vadd.f32 %v707_v16, %v1414_v34  ;;  %v710_v24 = vadd.f32 %v708_v14, %v1417_v35 }
 0x40f   :  { %v928_v53 = vpop.eup %927 }
 0x410   :  { %v930_v5 = vpop.eup %929  ;;  %v755_v30 = vmul.f32 %v928_v53, %v735_v19 }
 0x411   :  { %v756_v55 = vmul.f32 %v930_v5, %v736_v52 }
 0x412   :  { %935 = vlog2.f32 %v755_v30 }
 0x413   :  { %937 = vlog2.f32 %v756_v55  ;;  %v722_v62 = vpop.permute.xlu0 %721  ;;  %v720_v23 = vpop.permute.xlu1 %719 }
 0x414   :  { %v932_v4 = vpop.eup %931  ;;  %v723_v15 = vsel %vm698_vm11, %v720_v23, %v722_v62  ;;  %v724_v3 = vsel %vm698_vm11, %v722_v62, %v720_v23 }
 0x415   :  { %v934_v20 = vpop.eup %933  ;;  %v725_v48 = vadd.f32 %v723_v15, %v1437_v2  ;;  %v726_v10 = vadd.f32 %v724_v3, %v1440_v49  ;;  %v747_v63 = vmul.f32 %v932_v4, %v709_v57 }
 0x416   :  { %v748_v28 = vmul.f32 %v934_v20, %v710_v24 }
 0x417   :  { %v749_v18 = vmul.f32 %v928_v53, %v725_v48  ;;  %v750_v8 = vmul.f32 %v930_v5, %v726_v10  ;;  %v730_v33 = vpop.permute.xlu0 %729  ;;  %v728_v56 = vpop.permute.xlu1 %727 }
 0x418   :  { %v731_v26 = vsel %vm698_vm11, %v728_v56, %v730_v33  ;;  %v732_v41 = vsel %vm698_vm11, %v730_v33, %v728_v56  ;;  %vm576_vm11 = vcmp.eq.s32.totalorder %v1069_v27, 7 }
 0x419   :  { %v751_v29 = vsub.f32 %v747_v63, %v749_v18  ;;  %v733_v34 = vadd.f32 %v731_v26, %v1454_v42  ;;  %v734_v2 = vadd.f32 %v732_v41, %v1457_v32  ;;  %v752_v49 = vsub.f32 %v748_v28, %v750_v8 }
 0x41b   :  { %v780_v35 = vmul.f32 %v733_v34, %v733_v34  ;;  %v781_v6 = vmul.f32 %v734_v2, %v734_v2  ;;  %v753_v45 = vsub.f32 %v751_v29, %v1485_v13  ;;  %v754_v46 = vsub.f32 %v752_v49, %v1485_v13 }
 0x41c   :  { %v936_v22 = vpop.eup %935 }
 0x41d   :  { %v938_v17 = vpop.eup %937  ;;  %v783_v11 = vsel %vm52_vm12, %v781_v6, 0.0  ;;  %v758_v40 = vmul.f32 0.6931472, %v936_v22 }
 0x41e   :  { %v784_v59 = vadd.f32 %v783_v11, %v780_v35  ;;  %v760_v37 = vmul.f32 0.6931472, %v938_v17 }
 0x41f   :  { %v761_v42 = vsub.f32 %v753_v45, %v758_v40 }
 0x420   :  { %785 = vadd.xlane.f32.xlu1 %v784_v59  ;;  %v762_v32 = vsub.f32 %v754_v46, %v760_v37 }
 0x421   :  { %v763_v39 = vand.u32 2147483647, %v761_v42 }
 0x422   :  { %v764_v12 = vand.u32 2147483647, %v762_v32 }
 0x424   :  { %v766_v50 = vsel %vm52_vm12, %v764_v12, 0.0 }
 0x425   :  { %v767_v36 = vadd.f32 %v766_v50, %v763_v39 }
 0x427   :  { %768 = vadd.xlane.f32.xlu0 %v767_v36 }
 0x451   :  { %v220_v31 = vpop.xlane.xlu0 %219 }
 0x452   :  { %v221_v7 = vrot.slane %v220_v31, 4 }
 0x454   :  { %v222_v43 = vadd.f32 %v221_v7, %v220_v31 }
 0x455   :  { %v317_v38 = vpop.xlane.xlu0 %316 }
 0x456   :  { %v223_v61 = vrot.slane %v222_v43, 2  ;;  %v318_v9 = vrot.slane %v317_v38, 4  ;;  %v203_v54 = vpop.xlane.xlu1 %202 }
 0x457   :  { %v204_v44 = vrot.slane %v203_v54, 4 }
 0x458   :  { %v319_v13 = vadd.f32 %v318_v9, %v317_v38  ;;  %v224_v19 = vadd.f32 %v223_v61, %v222_v43 }
 0x459   :  { %v205_v58 = vadd.f32 %v204_v44, %v203_v54  ;;  %v430_v0 = vpop.xlane.xlu0 %429 }
 0x45a   :  { %v320_v1 = vrot.slane %v319_v13, 2  ;;  %v431_v60 = vrot.slane %v430_v0, 4  ;;  %v334_v21 = vpop.xlane.xlu1 %333  ;;  %v225_v62 = vrot.slane %v224_v19, 1 }
 0x45b   :  { %v206_v52 = vrot.slane %v205_v58, 2  ;;  %v335_v51 = vrot.slane %v334_v21, 4 }
 0x45c   :  { %v432_v53 = vadd.f32 %v431_v60, %v430_v0  ;;  %v321_v25 = vadd.f32 %v320_v1, %v319_v13  ;;  %v226_v28 = vadd.f32 %v225_v62, %v224_v19 }
 0x45d   :  { %v336_v47 = vadd.f32 %v335_v51, %v334_v21  ;;  %v543_v5 = vpop.xlane.xlu0 %542  ;;  %v207_v30 = vadd.f32 %v206_v52, %v205_v58 }
 0x45e   :  { %v433_v55 = vrot.slane %v432_v53, 2  ;;  %v544_v16 = vrot.slane %v543_v5, 4  ;;  %v447_v14 = vpop.xlane.xlu1 %446  ;;  %v322_v23 = vrot.slane %v321_v25, 1 }
 0x45f   :  { %v337_v4 = vrot.slane %v336_v47, 2  ;;  %v448_v15 = vrot.slane %v447_v14, 4  ;;  %v208_v3 = vrot.slane %v207_v30, 1 }
 0x460   :  { %v545_v20 = vadd.f32 %v544_v16, %v543_v5  ;;  %v434_v57 = vadd.f32 %v433_v55, %v432_v53  ;;  %v323_v63 = vadd.f32 %v322_v23, %v321_v25 }
 0x461   :  { %v449_v48 = vadd.f32 %v448_v15, %v447_v14  ;;  %v656_v10 = vpop.xlane.xlu0 %655  ;;  %v209_v24 = vadd.f32 %v208_v3, %v207_v30  ;;  %v338_v18 = vadd.f32 %v337_v4, %v336_v47  ;;  %v1655_v30 = vlaneseq }
 0x462   :  { %v546_v8 = vrot.slane %v545_v20, 2  ;;  %v657_v33 = vrot.slane %v656_v10, 4  ;;  %v560_v56 = vpop.xlane.xlu1 %559  ;;  %v435_v26 = vrot.slane %v434_v57, 1 }
 0x463   :  { %v450_v41 = vrot.slane %v449_v48, 2  ;;  %v561_v29 = vrot.slane %v560_v56, 4  ;;  %825 = vpush %v209_v24  ;;  %v339_v34 = vrot.slane %v338_v18, 1  ;;  %v1600_v55 = vshrl.u32 %v1655_v30, 7 }
 0x464   :  { %v658_v2 = vadd.f32 %v657_v33, %v656_v10  ;;  %827 = vpush %v226_v28  ;;  %v436_v49 = vadd.f32 %v435_v26, %v434_v57  ;;  %v547_v35 = vadd.f32 %v546_v8, %v545_v20 }
 0x465   :  { %v562_v6 = vadd.f32 %v561_v29, %v560_v56  ;;  %829 = vpush %v323_v63  ;;  %v340_v22 = vadd.f32 %v339_v34, %v338_v18  ;;  %v451_v17 = vadd.f32 %v450_v41, %v449_v48  ;;  %vm231_vm13 = vcmp.eq.s32.totalorder %v1600_v55, 0 }
 0x466   :  { %v659_v11 = vrot.slane %v658_v2, 2  ;;  %v673_v45 = vpop.xlane.xlu1 %672  ;;  %v548_v40 = vrot.slane %v547_v35, 1  ;;  %vm233_vm0 = vmand %vm231_vm13, %vm232_vm14 }
 0x467   :  { %v563_v59 = vrot.slane %v562_v6, 2  ;;  %v674_v46 = vrot.slane %v673_v45, 4  ;;  %831 = vpush %v340_v22  ;;  %v452_v37 = vrot.slane %v451_v17, 1  ;;  %vm238_vm1 = vmand %vm231_vm13, %vm237_vm15  ;;  %vm684_vm15 = vcmp.eq.s32.totalorder %v1069_v27, 8 }
 0x468   :  { %833 = vpush %v436_v49  ;;  %v549_v42 = vadd.f32 %v548_v40, %v547_v35  ;;  %v660_v32 = vadd.f32 %v659_v11, %v658_v2  ;;  %vm346_vm4 = vmand %vm231_vm13, %vm345_vm2 }
 0x469   :  { %v675_v39 = vadd.f32 %v674_v46, %v673_v45  ;;  %v453_v12 = vadd.f32 %v452_v37, %v451_v17  ;;  %v564_v50 = vadd.f32 %v563_v59, %v562_v6  ;;  %vm351_vm5 = vmand %vm231_vm13, %vm350_vm3  ;;  %vm797_vm3 = vcmp.eq.s32.totalorder %v1069_v27, 10 }
 0x46a   :  { %v661_v36 = vrot.slane %v660_v32, 1  ;;  %vm459_vm8 = vmand %vm231_vm13, %vm458_vm6 }
 0x46b   :  { %v676_v31 = vrot.slane %v675_v39, 2  ;;  %835 = vpush %v453_v12  ;;  %v565_v7 = vrot.slane %v564_v50, 1  ;;  %vm464_vm9 = vmand %vm231_vm13, %vm463_vm7 }
 0x46c   :  { %837 = vpush %v549_v42  ;;  %v662_v43 = vadd.f32 %v661_v36, %v660_v32  ;;  %vm572_vm12 = vmand %vm231_vm13, %vm571_vm10 }
 0x46d   :  { %v566_v38 = vadd.f32 %v565_v7, %v564_v50  ;;  %v677_v61 = vadd.f32 %v676_v31, %v675_v39  ;;  %vm577_vm14 = vmand %vm231_vm13, %vm576_vm11 }
 0x46f   :  { %839 = vpush %v566_v38  ;;  %v678_v9 = vrot.slane %v677_v61, 1 }
 0x470   :  { %841 = vpush %v662_v43 }
 0x471   :  { %v679_v54 = vadd.f32 %v678_v9, %v677_v61 }
 0x473   :  { %843 = vpush %v679_v54 }
 0x494   :  { %s826_s10 = spop %825 }
 0x495   :  { %s828_s11 = spop %827  ;;  %s213_s12 = smul.f32 0.25, %s826_s10 }
 0x496   :  { %s230_s13 = smul.f32 0.0625, %s828_s11  ;;  %s830_s14 = spop %829 }
 0x497   :  { %v234_v16 = vstv %s213_s12  ;;  %s327_s16 = smul.f32 0.125, %s830_s14 }
 0x498   :  { %v239_v14 = vstv %s230_s13  ;;  %s832_s15 = spop %831  ;;  %v235_v62 = vsel %vm233_vm0, %v234_v16, 0.0  ;;  %vm689_vm0 = vcmp.eq.s32.totalorder %v1069_v27, 9 }
 0x499   :  { %v240_v23 = vsel %vm238_vm1, %v239_v14, 0.0  ;;  %s344_s17 = smul.f32 0.015625, %s832_s15  ;;  %v347_v15 = vstv %s327_s16  ;;  %s834_s18 = spop %833  ;;  %vm685_vm1 = vmand %vm231_vm13, %vm684_vm15 }
 0x49a   :  { %v241_v4 = vadd.f32 %v240_v23, %v235_v62  ;;  %v348_v20 = vsel %vm346_vm4, %v347_v15, 0.0  ;;  %s440_s20 = smul.f32 0.0625, %s834_s18  ;;  %vm690_vm2 = vmand %vm231_vm13, %vm689_vm0  ;;  %vm802_vm4 = vcmp.eq.s32.totalorder %v1069_v27, 11 }
 0x49b   :  { %v352_v3 = vstv %s344_s17  ;;  %vm803_vm6 = vmand %vm231_vm13, %vm802_vm4 }
 0x49c   :  { %s836_s19 = spop %835  ;;  %v349_v57 = vadd.f32 %v348_v20, %v241_v4  ;;  %v353_v48 = vsel %vm351_vm5, %v352_v3, 0.0  ;;  %v460_v24 = vstv %s440_s20  ;;  %vm798_vm5 = vmand %vm231_vm13, %vm797_vm3 }
 0x49d   :  { %s457_s21 = smul.f32 0.00390625, %s836_s19  ;;  %s838_s22 = spop %837  ;;  %v461_v18 = vsel %vm459_vm8, %v460_v24, 0.0 }
 0x49e   :  { %v354_v10 = vadd.f32 %v353_v48, %v349_v57  ;;  %s553_s24 = smul.f32 0.03125, %s838_s22 }
 0x49f   :  { %v465_v63 = vstv %s457_s21 }
 0x4a0   :  { %s840_s23 = spop %839  ;;  %v462_v8 = vadd.f32 %v461_v18, %v354_v10  ;;  %v466_v33 = vsel %vm464_vm9, %v465_v63, 0.0  ;;  %v573_v28 = vstv %s553_s24 }
 0x4a1   :  { %s570_s25 = smul.f32 0.0009765625, %s840_s23  ;;  %s842_s26 = spop %841  ;;  %v574_v41 = vsel %vm572_vm12, %v573_v28, 0.0 }
 0x4a2   :  { %v467_v56 = vadd.f32 %v466_v33, %v462_v8  ;;  %s666_s28 = smul.f32 0.015625, %s842_s26 }
 0x4a3   :  { %v578_v26 = vstv %s570_s25 }
 0x4a4   :  { %s844_s27 = spop %843  ;;  %v575_v29 = vadd.f32 %v574_v41, %v467_v56  ;;  %v579_v34 = vsel %vm577_vm14, %v578_v26, 0.0  ;;  %v686_v49 = vstv %s666_s28 }
 0x4a5   :  { %s683_s29 = smul.f32 0.00024414063, %s844_s27  ;;  %v687_v6 = vsel %vm685_vm1, %v686_v49, 0.0 }
 0x4a6   :  { %v580_v2 = vadd.f32 %v579_v34, %v575_v29 }
 0x4a7   :  { %v691_v35 = vstv %s683_s29 }
 0x4a8   :  { %v688_v22 = vadd.f32 %v687_v6, %v580_v2  ;;  %v692_v17 = vsel %vm690_vm2, %v691_v35, 0.0 }
 0x4aa   :  { %v693_v11 = vadd.f32 %v692_v17, %v688_v22 }
 0x4ad   :  { %v786_v44 = vpop.xlane.xlu1 %785 }
 0x4ae   :  { %v787_v13 = vrot.slane %v786_v44, 4 }
 0x4b0   :  { %v788_v58 = vadd.f32 %v787_v13, %v786_v44 }
 0x4b2   :  { %v789_v0 = vrot.slane %v788_v58, 2 }
 0x4b4   :  { %v769_v1 = vpop.xlane.xlu0 %768  ;;  %v790_v19 = vadd.f32 %v789_v0, %v788_v58 }
 0x4b5   :  { %v770_v60 = vrot.slane %v769_v1, 4 }
 0x4b6   :  { %v791_v53 = vrot.slane %v790_v19, 1 }
 0x4b7   :  { %v771_v21 = vadd.f32 %v770_v60, %v769_v1 }
 0x4b8   :  { %v792_v5 = vadd.f32 %v791_v53, %v790_v19 }
 0x4b9   :  { %v772_v52 = vrot.slane %v771_v21, 2 }
 0x4bb   :  { %v773_v51 = vadd.f32 %v772_v52, %v771_v21 }
 0x4bd   :  { %v774_v25 = vrot.slane %v773_v51, 1 }
 0x4bf   :  { %v775_v47 = vadd.f32 %v774_v25, %v773_v51 }
 0x4c1   :  { %845 = vpush %v775_v47 }
 0x4c2   :  { %847 = vpush %v792_v5 }
 0x4f2   :  { %s846_s30 = spop %845 }
 0x4f3   :  { %s779_s0 = smul.f32 0.0078125, %s846_s30  ;;  %s848_s3 = spop %847 }
 0x4f4   :  { %s796_s1 = smul.f32 6.1035156e-05, %s848_s3 }
 0x4f5   :  { %v799_v45 = vstv %s779_s0 }
 0x4f6   :  { %v800_v40 = vsel %vm798_vm5, %v799_v45, 0.0  ;;  %v804_v59 = vstv %s796_s1 }
 0x4f7   :  { %v801_v46 = vadd.f32 %v800_v40, %v693_v11  ;;  %v805_v37 = vsel %vm803_vm6, %v804_v59, 0.0 }
 0x4f9   :  { %v806_v42 = vadd.f32 %v805_v37, %v801_v46 }
 0x4fb   :  { %808 = vst [vmem:[#allocation7] sm:$0xff] %v806_v42 }
 0x4fc   :  { %994 = shalt.err (!%p991_p6)
}
 0x4fd   :  { %s995_s9 = scalar_lea.hbm %s1653_s2, 128 }
 0x4fe   :  { %p996_p7 = scmp.ne.s32.totalorder %s1653_s2, %s995_s9  ;;  %p999_p8 = scmp.lt.u32.totalorder %s995_s9, %s1653_s2 }
 0x500   :  { %p1001_p9 = pnand %p999_p8, %p996_p7 }
 0x502   :  { %1004 = shalt.err (!%p1001_p9)
}
 0x503   :  { %818 = dma.vmem_to_hbm [thread:$0]  %s816_s5, 128, %s1653_s2, [#allocation4]  }
 0x504   :  { %1009 = dma.done.wait [#allocation4], 128  }
 0x505   :  { %1010 = vsyncadd [#allocation4], 4294967168 }
 0x506   :  { %822 = vsyncpa [#allocation3], 1 }
 0x507   :  { %823 = vsyncpa [#allocation6], 1 }
 0x508   :  { %824 = vsyncpa [#allocation4], 1 }

</bundles_post_ra>
